<compile_context>
chip_gen: v7x
topology: tpu7x:2x2x1
jax: 0.10.0
libtpu: 0.0.40
codegen_flags: <defaults>
</compile_context>

<pallas_src>
import math
import numpy as np

import jax
import jax.numpy as jnp
from jax.experimental import pallas as pl
from jax.experimental.pallas import tpu as pltpu


# ---------------------- interpolation coefficient helpers ------------------- #

def _linear_coeffs(in_size: int, out_size: int):
    """PyTorch F.interpolate linear coefficients (align_corners=False).

    With recompute_scale_factor=True (or an explicit size) PyTorch uses
    scale = in/out and src = scale * (dst + 0.5) - 0.5, clamped at 0.
    Returns (i0, i1, lam) numpy arrays of length out_size.
    """
    scale = in_size / out_size
    j = np.arange(out_size, dtype=np.float64)
    src = np.maximum(scale * (j + 0.5) - 0.5, 0.0)
    i0 = np.minimum(np.floor(src).astype(np.int64), in_size - 1)
    lam = src - i0
    i1 = np.minimum(i0 + 1, in_size - 1)
    return i0, i1, lam


def _interp_matrix(in_size: int, out_size: int) -> np.ndarray:
    """Dense [out, in] matrix (2 nonzeros/row) such that out = M @ in."""
    i0, i1, lam = _linear_coeffs(in_size, out_size)
    m = np.zeros((out_size, in_size), dtype=np.float32)
    rows = np.arange(out_size)
    np.add.at(m, (rows, i0), (1.0 - lam).astype(np.float32))
    np.add.at(m, (rows, i1), lam.astype(np.float32))
    return m


def _round_up(x: int, m: int) -> int:
    return (x + m - 1) // m * m


def _vmem_limit_bytes(D, H, W, Dp, Hp, Wp):
    """Layout-padded, double-buffered VMEM footprint of one grid step + headroom."""
    f32 = 4

    def tile(rows, cols):  # VMEM layout pads the last two dims to (8, 128)
        return _round_up(max(rows, 1), 8) * _round_up(max(cols, 1), 128) * f32

    in_blk = D * tile(H, W)
    out_blk = Dp * tile(Hp, Wp)
    mats = tile(W, Wp) + tile(Hp, H)
    live = 6 * tile(Hp, Wp) + 2 * tile(H, Wp)      # in-flight slabs / temporaries
    total = 2 * (in_blk + out_blk) + 2 * mats + live
    limit = int(total * 1.25) + (4 << 20)
    # TODO(synk): if `limit` exceeds per-core VMEM (64 MiB on v7x) the kernel
    # needs D/H halo tiling rather than a larger limit.
    return max(16 << 20, min(limit, 120 << 20))


# ------------------------------- the kernel --------------------------------- #

def _build_kernel(D, H, W, Dn, Hn, Wn, Dp, Hp, Wp, d_taps):
    needs_hw_mask = (Hp > Hn) or (Wp > Wn)
    needs_d_zero = Dp > Dn
    dot_kwargs = dict(preferred_element_type=jnp.float32,
                      precision=jax.lax.Precision.HIGHEST)

    def kernel(norm_ref, x_ref, mwt_ref, mh_ref, o_ref):
        c = pl.program_id(1)
        sc = norm_ref[c, 0]                # 1/std        (SMEM scalar)
        sh = norm_ref[c, 1]                # -mean/std    (SMEM scalar)

        mwt = mwt_ref[...]                 # [W, Wp]  (columns >= Wn are zero)
        mh = mh_ref[...]                   # [Hp, H]  (rows    >= Hn are zero)

        # Hoisted per-channel affine operands at slab shape (one broadcast /
        # mask for the whole depth loop).  After the padded matmuls the H/W
        # padding region of each slab is exactly zero, so only the additive
        # shift needs masking to preserve torch's zero padding.
        sc_b = jnp.broadcast_to(sc, (Hp, Wp))
        if needs_hw_mask:
            ri = jax.lax.broadcasted_iota(jnp.int32, (Hp, Wp), 0)
            ci = jax.lax.broadcasted_iota(jnp.int32, (Hp, Wp), 1)
            sh_b = jnp.where((ri < Hn) & (ci < Wn), sh, 0.0)
        else:
            sh_b = jnp.broadcast_to(sh, (Hp, Wp))

        # Lazily-memoized separable W/H interpolation of one input depth
        # slice.  d_taps is monotone, so lazy evaluation bounds the number of
        # live [Hp, Wp] intermediates to ~2 independent of D.
        slab_cache = {}

        def hw_slab(d):
            if d not in slab_cache:
                xw = jnp.dot(x_ref[0, d], mwt, **dot_kwargs)      # [H,  Wp]
                slab_cache[d] = jnp.dot(mh, xw, **dot_kwargs)     # [Hp, Wp]
            return slab_cache[d]

        # Depth lerp (2 static taps per output depth) + fused normalization;
        # one full-width lane-dense [Hp, Wp] store per output slab.
        for dn, (i0, i1, lam) in enumerate(d_taps):
            if i0 == i1 or lam == 0.0:
                y = hw_slab(i0)
            else:
                y = (1.0 - lam) * hw_slab(i0) + lam * hw_slab(i1)
            o_ref[0, dn, :, :] = y * sc_b + sh_b

        # Zero only the depth padding introduced by batch_images (the interior
        # is never stored twice).
        if needs_d_zero:
            o_ref[0, Dn:Dp, :, :] = jnp.zeros((Dp - Dn, Hp, Wp), o_ref.dtype)

    return kernel


# ------------------------------ the transform -------------------------------- #

class GeneralizedRCNNTransformPallas:
    """Inference-path forward of GeneralizedRCNNTransform (no targets/masks)."""

    def __init__(self, min_size, max_size, image_mean, image_std,
                 size_divisible=32, fixed_size=None, **kwargs):
        if not isinstance(min_size, (list, tuple)):
            min_size = (min_size,)
        self.min_size = min_size
        self.max_size = max_size
        self.image_mean = image_mean
        self.image_std = image_std
        self.size_divisible = size_divisible
        self.fixed_size = fixed_size
        self._skip_resize = kwargs.pop("skip_resize", False)      # training-only
        self._skip_normalize = kwargs.pop("skip_normalize", False)

    # --- resized spatial size (matches torch _resize_image_and_masks) ---
    def _output_size(self, d, h, w):
        if self.fixed_size is not None:
            # torch passes size=[fixed_size[2], fixed_size[1], fixed_size[0]]
            return (int(self.fixed_size[2]), int(self.fixed_size[1]),
                    int(self.fixed_size[0]))
        size = float(self.min_size[-1])
        min_s = float(min((d, h, w)))
        max_s = float(max((d, h, w)))
        scale = min(size / min_s, float(self.max_size) / max_s)
        # recompute_scale_factor=True -> out = floor(in * scale)
        return (int(math.floor(d * scale)),
                int(math.floor(h * scale)),
                int(math.floor(w * scale)))

    def __call__(self, images):
        # images: [B, C, D, H, W] float (inference path: targets=None)
        images = jnp.asarray(images, jnp.float32)
        B, C, D, H, W = images.shape
        Dn, Hn, Wn = self._output_size(D, H, W)

        sd = float(self.size_divisible)
        Dp = int(math.ceil(Dn / sd) * sd)
        Hp = int(math.ceil(Hn / sd) * sd)
        Wp = int(math.ceil(Wn / sd) * sd)

        # Tiny host-side interpolation operands; the H/W padding is folded in
        # as zero rows / zero columns so in-kernel stores are always full
        # [Hp, Wp] slabs (no partial masked stores, no pre-zeroing).
        mwt = np.zeros((W, Wp), np.float32)
        mwt[:, :Wn] = _interp_matrix(W, Wn).T                     # [W, Wp]
        mh = np.zeros((Hp, H), np.float32)
        mh[:Hn, :] = _interp_matrix(H, Hn)                        # [Hp, H]
        di0, di1, dlam = _linear_coeffs(D, Dn)
        d_taps = [(int(a), int(b), float(l)) for a, b, l in zip(di0, di1, dlam)]

        # Per-channel affine: (x - mean)/std == x*inv_std - mean*inv_std.
        if self._skip_normalize:
            inv_std = np.ones((C,), np.float32)
            shift_v = np.zeros((C,), np.float32)
        else:
            inv_std = (1.0 / np.asarray(self.image_std, np.float32)).astype(np.float32)
            shift_v = (-np.asarray(self.image_mean, np.float32) * inv_std).astype(np.float32)
        norm_tab = jnp.asarray(np.stack([inv_std, shift_v], axis=1))   # [C, 2] -> SMEM

        # Fold batch & channel into the leading block axis (free reshape).
        x4 = images.reshape(B * C, D, H, W)

        kernel = _build_kernel(D, H, W, Dn, Hn, Wn, Dp, Hp, Wp, d_taps)
        out = pl.pallas_call(
            kernel,
            out_shape=jax.ShapeDtypeStruct((B * C, Dp, Hp, Wp), jnp.float32),
            grid=(B, C),
            in_specs=[
                pl.BlockSpec(memory_space=pltpu.MemorySpace.SMEM),        # [C, 2] norm table
                pl.BlockSpec((1, D, H, W), lambda b, c: (b * C + c, 0, 0, 0)),
                pl.BlockSpec((W, Wp), lambda b, c: (0, 0)),               # W interp^T (col-padded)
                pl.BlockSpec((Hp, H), lambda b, c: (0, 0)),               # H interp   (row-padded)
            ],
            out_specs=pl.BlockSpec((1, Dp, Hp, Wp),
                                   lambda b, c: (b * C + c, 0, 0, 0)),
            compiler_params=pltpu.CompilerParams(
                dimension_semantics=("parallel", "parallel"),
                vmem_limit_bytes=_vmem_limit_bytes(D, H, W, Dp, Hp, Wp)),
        )(norm_tab, x4, jnp.asarray(mwt), jnp.asarray(mh))

        batched = out.reshape(B, C, Dp, Hp, Wp)
        image_sizes = [(Dn, Hn, Wn)] * B
        # TODO(synk): training-only target handling (mask interpolation,
        # resize_boxes, torch_choice RNG) is not exercised by the inference
        # forward and is omitted.
        return batched, image_sizes


# ------------------------- pure-numpy reference check ------------------------ #

def _reference_forward(x, transform):
    x = np.asarray(x, np.float64)
    B, C, D, H, W = x.shape
    Dn, Hn, Wn = transform._output_size(D, H, W)
    if transform._skip_normalize:
        y = x
    else:
        mean = np.asarray(transform.image_mean, np.float64).reshape(1, C, 1, 1, 1)
        std = np.asarray(transform.image_std, np.float64).reshape(1, C, 1, 1, 1)
        y = (x - mean) / std
    mw = _interp_matrix(W, Wn).astype(np.float64)
    mh = _interp_matrix(H, Hn).astype(np.float64)
    md = _interp_matrix(D, Dn).astype(np.float64)
    y = np.einsum('bcdhw,xw->bcdhx', y, mw)
    y = np.einsum('bcdhx,yh->bcdyx', y, mh)
    y = np.einsum('bcdyx,zd->bczyx', y, md)
    sd = float(transform.size_divisible)
    Dp, Hp, Wp = (int(math.ceil(s / sd) * sd) for s in (Dn, Hn, Wn))
    out = np.zeros((B, C, Dp, Hp, Wp), np.float64)
    out[:, :, :Dn, :Hn, :Wn] = y
    return out


# ----------------------------------- main ------------------------------------ #

if __name__ == "__main__":
    key = jax.random.PRNGKey(0)
    # batch=2, C=4, D=8, H=16, W=16  ([B, C, D, H, W] volumetric images)
    x = jax.random.uniform(key, (2, 4, 8, 16, 16), dtype=jnp.float32)

    transform = GeneralizedRCNNTransformPallas(
        min_size=12,
        max_size=24,
        image_mean=[0.485, 0.456, 0.406, 0.440],
        image_std=[0.229, 0.224, 0.225, 0.230],
        size_divisible=32,      # torchvision default; exercises D, H and W padding
    )

    batched, image_sizes = transform(x)
    batched = jax.block_until_ready(batched)

    # scale = min(12/8, 24/16) = 1.5 -> resized (12, 24, 24); padded to /32.
    assert image_sizes == [(12, 24, 24), (12, 24, 24)], image_sizes
    assert batched.shape == (2, 4, 32, 32, 32), batched.shape
    assert batched.dtype == jnp.float32

    # Numerical check against a float64 numpy reference.  The in-kernel
    # matmuls use precision=HIGHEST so the error is ~1e-6; the tolerance is
    # kept loose on purpose (wiring bugs produce O(1) errors).
    ref = _reference_forward(x, transform)
    np.testing.assert_allclose(np.asarray(batched), ref, rtol=3e-2, atol=3e-2)

    print("KERNEL_OK")
</pallas_src>

<mosaic_0001>
module attributes {stable_mosaic.version = 11 : i64} {
  func.func @kernel(%arg0: i32, %arg1: i32, %arg2: memref<4x2xf32, #tpu.memory_space<smem>>, %arg3: memref<1x8x16x16xf32, #tpu.memory_space<vmem>>, %arg4: memref<16x32xf32, #tpu.memory_space<vmem>>, %arg5: memref<32x16xf32, #tpu.memory_space<vmem>>, %arg6: memref<1x32x32x32xf32, #tpu.memory_space<vmem>>) attributes {dimension_semantics = [#tpu.dimension_semantics<parallel>, #tpu.dimension_semantics<parallel>], iteration_bounds = array<i64: 2, 4>, scalar_prefetch = 0 : i64, scratch_operands = 0 : i64, tpu.core_type = #tpu.core_type<tc>, window_params = [{transform_indices = @transform_0, window_bounds = array<i64: 4, 2>}, {transform_indices = @transform_1, window_bounds = array<i64: 1, 8, 16, 16>}, {pipeline_mode = #tpu.pipeline_mode<synchronous>, transform_indices = @transform_2, window_bounds = array<i64: 16, 32>}, {pipeline_mode = #tpu.pipeline_mode<synchronous>, transform_indices = @transform_3, window_bounds = array<i64: 32, 16>}, {transform_indices = @transform_4, window_bounds = array<i64: 1, 32, 32, 32>}]} {
    %0 = arith.index_cast %arg1 : i32 to index
    %c0 = arith.constant 0 : index
    %1 = memref.load %arg2[%0, %c0] : memref<4x2xf32, #tpu.memory_space<smem>>
    %2 = arith.index_cast %arg1 : i32 to index
    %c1 = arith.constant 1 : index
    %3 = memref.load %arg2[%2, %c1] : memref<4x2xf32, #tpu.memory_space<smem>>
    %c0_0 = arith.constant 0 : index
    %c0_1 = arith.constant 0 : index
    %4 = vector.load %arg4[%c0_0, %c0_1] : memref<16x32xf32, #tpu.memory_space<vmem>>, vector<16x32xf32>
    %c0_2 = arith.constant 0 : index
    %c0_3 = arith.constant 0 : index
    %5 = vector.load %arg5[%c0_2, %c0_3] : memref<32x16xf32, #tpu.memory_space<vmem>>, vector<32x16xf32>
    %6 = vector.broadcast %1 : f32 to vector<32x32xf32>
    %7 = tpu.iota {dimensions = array<i32: 0>} : vector<32x32xi32>
    %8 = tpu.iota {dimensions = array<i32: 1>} : vector<32x32xi32>
    %c24_i32 = arith.constant 24 : i32
    %9 = vector.broadcast %c24_i32 : i32 to vector<32x32xi32>
    %10 = arith.cmpi slt, %7, %9 : vector<32x32xi32>
    %c24_i32_4 = arith.constant 24 : i32
    %11 = vector.broadcast %c24_i32_4 : i32 to vector<32x32xi32>
    %12 = arith.cmpi slt, %8, %11 : vector<32x32xi32>
    %13 = arith.andi %10, %12 : vector<32x32xi1>
    %cst = arith.constant 0.000000e+00 : f32
    %14 = vector.broadcast %3 : f32 to vector<32x32xf32>
    %15 = vector.broadcast %cst : f32 to vector<32x32xf32>
    %16 = arith.select %13, %14, %15 : vector<32x32xi1>, vector<32x32xf32>
    %c0_5 = arith.constant 0 : index
    %c0_6 = arith.constant 0 : index
    %c0_7 = arith.constant 0 : index
    %c0_8 = arith.constant 0 : index
    %17 = vector.load %arg3[%c0_5, %c0_6, %c0_7, %c0_8] : memref<1x8x16x16xf32, #tpu.memory_space<vmem>>, vector<1x1x16x16xf32>
    %18 = vector.shape_cast %17 : vector<1x1x16x16xf32> to vector<16x16xf32>
    %cst_9 = arith.constant dense<0.000000e+00> : vector<16x32xf32>
    %19 = tpu.matmul %18, %4, %cst_9 {dimension_numbers = #tpu.dot_dimension_numbers<[1], [0], [0], [1], [0, 0, 1, 1], [], []>, precision = #tpu.contract_precision<fp32>} : vector<16x16xf32>, vector<16x32xf32>, vector<16x32xf32> -> vector<16x32xf32>
    %cst_10 = arith.constant dense<0.000000e+00> : vector<32x32xf32>
    %20 = tpu.matmul %5, %19, %cst_10 {dimension_numbers = #tpu.dot_dimension_numbers<[1], [0], [0], [1], [0, 0, 1, 1], [], []>, precision = #tpu.contract_precision<fp32>} : vector<32x16xf32>, vector<16x32xf32>, vector<32x32xf32> -> vector<32x32xf32>
    %21 = arith.mulf %20, %6 : vector<32x32xf32>
    %22 = arith.addf %21, %16 : vector<32x32xf32>
    %c0_11 = arith.constant 0 : index
    %c0_12 = arith.constant 0 : index
    %c0_13 = arith.constant 0 : index
    %c0_14 = arith.constant 0 : index
    %23 = vector.load %arg6[%c0_11, %c0_12, %c0_13, %c0_14] : memref<1x32x32x32xf32, #tpu.memory_space<vmem>>, vector<1x1x32x32xf32>
    %24 = vector.shape_cast %23 : vector<1x1x32x32xf32> to vector<32x32xf32>
    %25 = vector.shape_cast %22 : vector<32x32xf32> to vector<1x1x32x32xf32>
    tpu.vector_store %arg6[%c0_11, %c0_12, %c0_13, %c0_14], %25 {strides = array<i32>} : memref<1x32x32x32xf32, #tpu.memory_space<vmem>>, vector<1x1x32x32xf32>,
    %cst_15 = arith.constant 5.000000e-01 : f32
    %26 = vector.broadcast %cst_15 : f32 to vector<32x32xf32>
    %27 = arith.mulf %26, %20 : vector<32x32xf32>
    %c0_16 = arith.constant 0 : index
    %c1_17 = arith.constant 1 : index
    %c0_18 = arith.constant 0 : index
    %c0_19 = arith.constant 0 : index
    %28 = vector.load %arg3[%c0_16, %c1_17, %c0_18, %c0_19] : memref<1x8x16x16xf32, #tpu.memory_space<vmem>>, vector<1x1x16x16xf32>
    %29 = vector.shape_cast %28 : vector<1x1x16x16xf32> to vector<16x16xf32>
    %cst_20 = arith.constant dense<0.000000e+00> : vector<16x32xf32>
    %30 = tpu.matmul %29, %4, %cst_20 {dimension_numbers = #tpu.dot_dimension_numbers<[1], [0], [0], [1], [0, 0, 1, 1], [], []>, precision = #tpu.contract_precision<fp32>} : vector<16x16xf32>, vector<16x32xf32>, vector<16x32xf32> -> vector<16x32xf32>
    %cst_21 = arith.constant dense<0.000000e+00> : vector<32x32xf32>
    %31 = tpu.matmul %5, %30, %cst_21 {dimension_numbers = #tpu.dot_dimension_numbers<[1], [0], [0], [1], [0, 0, 1, 1], [], []>, precision = #tpu.contract_precision<fp32>} : vector<32x16xf32>, vector<16x32xf32>, vector<32x32xf32> -> vector<32x32xf32>
    %cst_22 = arith.constant 5.000000e-01 : f32
    %32 = vector.broadcast %cst_22 : f32 to vector<32x32xf32>
    %33 = arith.mulf %32, %31 : vector<32x32xf32>
    %34 = arith.addf %27, %33 : vector<32x32xf32>
    %35 = arith.mulf %34, %6 : vector<32x32xf32>
    %36 = arith.addf %35, %16 : vector<32x32xf32>
    %c0_23 = arith.constant 0 : index
    %c1_24 = arith.constant 1 : index
    %c0_25 = arith.constant 0 : index
    %c0_26 = arith.constant 0 : index
    %37 = vector.load %arg6[%c0_23, %c1_24, %c0_25, %c0_26] : memref<1x32x32x32xf32, #tpu.memory_space<vmem>>, vector<1x1x32x32xf32>
    %38 = vector.shape_cast %37 : vector<1x1x32x32xf32> to vector<32x32xf32>
    %39 = vector.shape_cast %36 : vector<32x32xf32> to vector<1x1x32x32xf32>
    tpu.vector_store %arg6[%c0_23, %c1_24, %c0_25, %c0_26], %39 {strides = array<i32>} : memref<1x32x32x32xf32, #tpu.memory_space<vmem>>, vector<1x1x32x32xf32>,
    %cst_27 = arith.constant 0.833333313 : f32
    %40 = vector.broadcast %cst_27 : f32 to vector<32x32xf32>
    %41 = arith.mulf %40, %31 : vector<32x32xf32>
    %c0_28 = arith.constant 0 : index
    %c2 = arith.constant 2 : index
    %c0_29 = arith.constant 0 : index
    %c0_30 = arith.constant 0 : index
    %42 = vector.load %arg3[%c0_28, %c2, %c0_29, %c0_30] : memref<1x8x16x16xf32, #tpu.memory_space<vmem>>, vector<1x1x16x16xf32>
    %43 = vector.shape_cast %42 : vector<1x1x16x16xf32> to vector<16x16xf32>
    %cst_31 = arith.constant dense<0.000000e+00> : vector<16x32xf32>
    %44 = tpu.matmul %43, %4, %cst_31 {dimension_numbers = #tpu.dot_dimension_numbers<[1], [0], [0], [1], [0, 0, 1, 1], [], []>, precision = #tpu.contract_precision<fp32>} : vector<16x16xf32>, vector<16x32xf32>, vector<16x32xf32> -> vector<16x32xf32>
    %cst_32 = arith.constant dense<0.000000e+00> : vector<32x32xf32>
    %45 = tpu.matmul %5, %44, %cst_32 {dimension_numbers = #tpu.dot_dimension_numbers<[1], [0], [0], [1], [0, 0, 1, 1], [], []>, precision = #tpu.contract_precision<fp32>} : vector<32x16xf32>, vector<16x32xf32>, vector<32x32xf32> -> vector<32x32xf32>
    %cst_33 = arith.constant 0.166666672 : f32
    %46 = vector.broadcast %cst_33 : f32 to vector<32x32xf32>
    %47 = arith.mulf %46, %45 : vector<32x32xf32>
    %48 = arith.addf %41, %47 : vector<32x32xf32>
    %49 = arith.mulf %48, %6 : vector<32x32xf32>
    %50 = arith.addf %49, %16 : vector<32x32xf32>
    %c0_34 = arith.constant 0 : index
    %c2_35 = arith.constant 2 : index
    %c0_36 = arith.constant 0 : index
    %c0_37 = arith.constant 0 : index
    %51 = vector.load %arg6[%c0_34, %c2_35, %c0_36, %c0_37] : memref<1x32x32x32xf32, #tpu.memory_space<vmem>>, vector<1x1x32x32xf32>
    %52 = vector.shape_cast %51 : vector<1x1x32x32xf32> to vector<32x32xf32>
    %53 = vector.shape_cast %50 : vector<32x32xf32> to vector<1x1x32x32xf32>
    tpu.vector_store %arg6[%c0_34, %c2_35, %c0_36, %c0_37], %53 {strides = array<i32>} : memref<1x32x32x32xf32, #tpu.memory_space<vmem>>, vector<1x1x32x32xf32>,
    %cst_38 = arith.constant 0.166666672 : f32
    %54 = vector.broadcast %cst_38 : f32 to vector<32x32xf32>
    %55 = arith.mulf %54, %31 : vector<32x32xf32>
    %cst_39 = arith.constant 0.833333313 : f32
    %56 = vector.broadcast %cst_39 : f32 to vector<32x32xf32>
    %57 = arith.mulf %56, %45 : vector<32x32xf32>
    %58 = arith.addf %55, %57 : vector<32x32xf32>
    %59 = arith.mulf %58, %6 : vector<32x32xf32>
    %60 = arith.addf %59, %16 : vector<32x32xf32>
    %c0_40 = arith.constant 0 : index
    %c3 = arith.constant 3 : index
    %c0_41 = arith.constant 0 : index
    %c0_42 = arith.constant 0 : index
    %61 = vector.load %arg6[%c0_40, %c3, %c0_41, %c0_42] : memref<1x32x32x32xf32, #tpu.memory_space<vmem>>, vector<1x1x32x32xf32>
    %62 = vector.shape_cast %61 : vector<1x1x32x32xf32> to vector<32x32xf32>
    %63 = vector.shape_cast %60 : vector<32x32xf32> to vector<1x1x32x32xf32>
    tpu.vector_store %arg6[%c0_40, %c3, %c0_41, %c0_42], %63 {strides = array<i32>} : memref<1x32x32x32xf32, #tpu.memory_space<vmem>>, vector<1x1x32x32xf32>,
    %cst_43 = arith.constant 5.000000e-01 : f32
    %64 = vector.broadcast %cst_43 : f32 to vector<32x32xf32>
    %65 = arith.mulf %64, %45 : vector<32x32xf32>
    %c0_44 = arith.constant 0 : index
    %c3_45 = arith.constant 3 : index
    %c0_46 = arith.constant 0 : index
    %c0_47 = arith.constant 0 : index
    %66 = vector.load %arg3[%c0_44, %c3_45, %c0_46, %c0_47] : memref<1x8x16x16xf32, #tpu.memory_space<vmem>>, vector<1x1x16x16xf32>
    %67 = vector.shape_cast %66 : vector<1x1x16x16xf32> to vector<16x16xf32>
    %cst_48 = arith.constant dense<0.000000e+00> : vector<16x32xf32>
    %68 = tpu.matmul %67, %4, %cst_48 {dimension_numbers = #tpu.dot_dimension_numbers<[1], [0], [0], [1], [0, 0, 1, 1], [], []>, precision = #tpu.contract_precision<fp32>} : vector<16x16xf32>, vector<16x32xf32>, vector<16x32xf32> -> vector<16x32xf32>
    %cst_49 = arith.constant dense<0.000000e+00> : vector<32x32xf32>
    %69 = tpu.matmul %5, %68, %cst_49 {dimension_numbers = #tpu.dot_dimension_numbers<[1], [0], [0], [1], [0, 0, 1, 1], [], []>, precision = #tpu.contract_precision<fp32>} : vector<32x16xf32>, vector<16x32xf32>, vector<32x32xf32> -> vector<32x32xf32>
    %cst_50 = arith.constant 5.000000e-01 : f32
    %70 = vector.broadcast %cst_50 : f32 to vector<32x32xf32>
    %71 = arith.mulf %70, %69 : vector<32x32xf32>
    %72 = arith.addf %65, %71 : vector<32x32xf32>
    %73 = arith.mulf %72, %6 : vector<32x32xf32>
    %74 = arith.addf %73, %16 : vector<32x32xf32>
    %c0_51 = arith.constant 0 : index
    %c4 = arith.constant 4 : index
    %c0_52 = arith.constant 0 : index
    %c0_53 = arith.constant 0 : index
    %75 = vector.load %arg6[%c0_51, %c4, %c0_52, %c0_53] : memref<1x32x32x32xf32, #tpu.memory_space<vmem>>, vector<1x1x32x32xf32>
    %76 = vector.shape_cast %75 : vector<1x1x32x32xf32> to vector<32x32xf32>
    %77 = vector.shape_cast %74 : vector<32x32xf32> to vector<1x1x32x32xf32>
    tpu.vector_store %arg6[%c0_51, %c4, %c0_52, %c0_53], %77 {strides = array<i32>} : memref<1x32x32x32xf32, #tpu.memory_space<vmem>>, vector<1x1x32x32xf32>,
    %cst_54 = arith.constant 0.833333313 : f32
    %78 = vector.broadcast %cst_54 : f32 to vector<32x32xf32>
    %79 = arith.mulf %78, %69 : vector<32x32xf32>
    %c0_55 = arith.constant 0 : index
    %c4_56 = arith.constant 4 : index
    %c0_57 = arith.constant 0 : index
    %c0_58 = arith.constant 0 : index
    %80 = vector.load %arg3[%c0_55, %c4_56, %c0_57, %c0_58] : memref<1x8x16x16xf32, #tpu.memory_space<vmem>>, vector<1x1x16x16xf32>
    %81 = vector.shape_cast %80 : vector<1x1x16x16xf32> to vector<16x16xf32>
    %cst_59 = arith.constant dense<0.000000e+00> : vector<16x32xf32>
    %82 = tpu.matmul %81, %4, %cst_59 {dimension_numbers = #tpu.dot_dimension_numbers<[1], [0], [0], [1], [0, 0, 1, 1], [], []>, precision = #tpu.contract_precision<fp32>} : vector<16x16xf32>, vector<16x32xf32>, vector<16x32xf32> -> vector<16x32xf32>
    %cst_60 = arith.constant dense<0.000000e+00> : vector<32x32xf32>
    %83 = tpu.matmul %5, %82, %cst_60 {dimension_numbers = #tpu.dot_dimension_numbers<[1], [0], [0], [1], [0, 0, 1, 1], [], []>, precision = #tpu.contract_precision<fp32>} : vector<32x16xf32>, vector<16x32xf32>, vector<32x32xf32> -> vector<32x32xf32>
    %cst_61 = arith.constant 0.166666672 : f32
    %84 = vector.broadcast %cst_61 : f32 to vector<32x32xf32>
    %85 = arith.mulf %84, %83 : vector<32x32xf32>
    %86 = arith.addf %79, %85 : vector<32x32xf32>
    %87 = arith.mulf %86, %6 : vector<32x32xf32>
    %88 = arith.addf %87, %16 : vector<32x32xf32>
    %c0_62 = arith.constant 0 : index
    %c5 = arith.constant 5 : index
    %c0_63 = arith.constant 0 : index
    %c0_64 = arith.constant 0 : index
    %89 = vector.load %arg6[%c0_62, %c5, %c0_63, %c0_64] : memref<1x32x32x32xf32, #tpu.memory_space<vmem>>, vector<1x1x32x32xf32>
    %90 = vector.shape_cast %89 : vector<1x1x32x32xf32> to vector<32x32xf32>
    %91 = vector.shape_cast %88 : vector<32x32xf32> to vector<1x1x32x32xf32>
    tpu.vector_store %arg6[%c0_62, %c5, %c0_63, %c0_64], %91 {strides = array<i32>} : memref<1x32x32x32xf32, #tpu.memory_space<vmem>>, vector<1x1x32x32xf32>,
    %cst_65 = arith.constant 0.166666672 : f32
    %92 = vector.broadcast %cst_65 : f32 to vector<32x32xf32>
    %93 = arith.mulf %92, %69 : vector<32x32xf32>
    %cst_66 = arith.constant 0.833333313 : f32
    %94 = vector.broadcast %cst_66 : f32 to vector<32x32xf32>
    %95 = arith.mulf %94, %83 : vector<32x32xf32>
    %96 = arith.addf %93, %95 : vector<32x32xf32>
    %97 = arith.mulf %96, %6 : vector<32x32xf32>
    %98 = arith.addf %97, %16 : vector<32x32xf32>
    %c0_67 = arith.constant 0 : index
    %c6 = arith.constant 6 : index
    %c0_68 = arith.constant 0 : index
    %c0_69 = arith.constant 0 : index
    %99 = vector.load %arg6[%c0_67, %c6, %c0_68, %c0_69] : memref<1x32x32x32xf32, #tpu.memory_space<vmem>>, vector<1x1x32x32xf32>
    %100 = vector.shape_cast %99 : vector<1x1x32x32xf32> to vector<32x32xf32>
    %101 = vector.shape_cast %98 : vector<32x32xf32> to vector<1x1x32x32xf32>
    tpu.vector_store %arg6[%c0_67, %c6, %c0_68, %c0_69], %101 {strides = array<i32>} : memref<1x32x32x32xf32, #tpu.memory_space<vmem>>, vector<1x1x32x32xf32>,
    %cst_70 = arith.constant 5.000000e-01 : f32
    %102 = vector.broadcast %cst_70 : f32 to vector<32x32xf32>
    %103 = arith.mulf %102, %83 : vector<32x32xf32>
    %c0_71 = arith.constant 0 : index
    %c5_72 = arith.constant 5 : index
    %c0_73 = arith.constant 0 : index
    %c0_74 = arith.constant 0 : index
    %104 = vector.load %arg3[%c0_71, %c5_72, %c0_73, %c0_74] : memref<1x8x16x16xf32, #tpu.memory_space<vmem>>, vector<1x1x16x16xf32>
    %105 = vector.shape_cast %104 : vector<1x1x16x16xf32> to vector<16x16xf32>
    %cst_75 = arith.constant dense<0.000000e+00> : vector<16x32xf32>
    %106 = tpu.matmul %105, %4, %cst_75 {dimension_numbers = #tpu.dot_dimension_numbers<[1], [0], [0], [1], [0, 0, 1, 1], [], []>, precision = #tpu.contract_precision<fp32>} : vector<16x16xf32>, vector<16x32xf32>, vector<16x32xf32> -> vector<16x32xf32>
    %cst_76 = arith.constant dense<0.000000e+00> : vector<32x32xf32>
    %107 = tpu.matmul %5, %106, %cst_76 {dimension_numbers = #tpu.dot_dimension_numbers<[1], [0], [0], [1], [0, 0, 1, 1], [], []>, precision = #tpu.contract_precision<fp32>} : vector<32x16xf32>, vector<16x32xf32>, vector<32x32xf32> -> vector<32x32xf32>
    %cst_77 = arith.constant 5.000000e-01 : f32
    %108 = vector.broadcast %cst_77 : f32 to vector<32x32xf32>
    %109 = arith.mulf %108, %107 : vector<32x32xf32>
    %110 = arith.addf %103, %109 : vector<32x32xf32>
    %111 = arith.mulf %110, %6 : vector<32x32xf32>
    %112 = arith.addf %111, %16 : vector<32x32xf32>
    %c0_78 = arith.constant 0 : index
    %c7 = arith.constant 7 : index
    %c0_79 = arith.constant 0 : index
    %c0_80 = arith.constant 0 : index
    %113 = vector.load %arg6[%c0_78, %c7, %c0_79, %c0_80] : memref<1x32x32x32xf32, #tpu.memory_space<vmem>>, vector<1x1x32x32xf32>
    %114 = vector.shape_cast %113 : vector<1x1x32x32xf32> to vector<32x32xf32>
    %115 = vector.shape_cast %112 : vector<32x32xf32> to vector<1x1x32x32xf32>
    tpu.vector_store %arg6[%c0_78, %c7, %c0_79, %c0_80], %115 {strides = array<i32>} : memref<1x32x32x32xf32, #tpu.memory_space<vmem>>, vector<1x1x32x32xf32>,
    %cst_81 = arith.constant 0.833333313 : f32
    %116 = vector.broadcast %cst_81 : f32 to vector<32x32xf32>
    %117 = arith.mulf %116, %107 : vector<32x32xf32>
    %c0_82 = arith.constant 0 : index
    %c6_83 = arith.constant 6 : index
    %c0_84 = arith.constant 0 : index
    %c0_85 = arith.constant 0 : index
    %118 = vector.load %arg3[%c0_82, %c6_83, %c0_84, %c0_85] : memref<1x8x16x16xf32, #tpu.memory_space<vmem>>, vector<1x1x16x16xf32>
    %119 = vector.shape_cast %118 : vector<1x1x16x16xf32> to vector<16x16xf32>
    %cst_86 = arith.constant dense<0.000000e+00> : vector<16x32xf32>
    %120 = tpu.matmul %119, %4, %cst_86 {dimension_numbers = #tpu.dot_dimension_numbers<[1], [0], [0], [1], [0, 0, 1, 1], [], []>, precision = #tpu.contract_precision<fp32>} : vector<16x16xf32>, vector<16x32xf32>, vector<16x32xf32> -> vector<16x32xf32>
    %cst_87 = arith.constant dense<0.000000e+00> : vector<32x32xf32>
    %121 = tpu.matmul %5, %120, %cst_87 {dimension_numbers = #tpu.dot_dimension_numbers<[1], [0], [0], [1], [0, 0, 1, 1], [], []>, precision = #tpu.contract_precision<fp32>} : vector<32x16xf32>, vector<16x32xf32>, vector<32x32xf32> -> vector<32x32xf32>
    %cst_88 = arith.constant 0.166666672 : f32
    %122 = vector.broadcast %cst_88 : f32 to vector<32x32xf32>
    %123 = arith.mulf %122, %121 : vector<32x32xf32>
    %124 = arith.addf %117, %123 : vector<32x32xf32>
    %125 = arith.mulf %124, %6 : vector<32x32xf32>
    %126 = arith.addf %125, %16 : vector<32x32xf32>
    %c0_89 = arith.constant 0 : index
    %c8 = arith.constant 8 : index
    %c0_90 = arith.constant 0 : index
    %c0_91 = arith.constant 0 : index
    %127 = vector.load %arg6[%c0_89, %c8, %c0_90, %c0_91] : memref<1x32x32x32xf32, #tpu.memory_space<vmem>>, vector<1x1x32x32xf32>
    %128 = vector.shape_cast %127 : vector<1x1x32x32xf32> to vector<32x32xf32>
    %129 = vector.shape_cast %126 : vector<32x32xf32> to vector<1x1x32x32xf32>
    tpu.vector_store %arg6[%c0_89, %c8, %c0_90, %c0_91], %129 {strides = array<i32>} : memref<1x32x32x32xf32, #tpu.memory_space<vmem>>, vector<1x1x32x32xf32>,
    %cst_92 = arith.constant 0.166666672 : f32
    %130 = vector.broadcast %cst_92 : f32 to vector<32x32xf32>
    %131 = arith.mulf %130, %107 : vector<32x32xf32>
    %cst_93 = arith.constant 0.833333313 : f32
    %132 = vector.broadcast %cst_93 : f32 to vector<32x32xf32>
    %133 = arith.mulf %132, %121 : vector<32x32xf32>
    %134 = arith.addf %131, %133 : vector<32x32xf32>
    %135 = arith.mulf %134, %6 : vector<32x32xf32>
    %136 = arith.addf %135, %16 : vector<32x32xf32>
    %c0_94 = arith.constant 0 : index
    %c9 = arith.constant 9 : index
    %c0_95 = arith.constant 0 : index
    %c0_96 = arith.constant 0 : index
    %137 = vector.load %arg6[%c0_94, %c9, %c0_95, %c0_96] : memref<1x32x32x32xf32, #tpu.memory_space<vmem>>, vector<1x1x32x32xf32>
    %138 = vector.shape_cast %137 : vector<1x1x32x32xf32> to vector<32x32xf32>
    %139 = vector.shape_cast %136 : vector<32x32xf32> to vector<1x1x32x32xf32>
    tpu.vector_store %arg6[%c0_94, %c9, %c0_95, %c0_96], %139 {strides = array<i32>} : memref<1x32x32x32xf32, #tpu.memory_space<vmem>>, vector<1x1x32x32xf32>,
    %cst_97 = arith.constant 5.000000e-01 : f32
    %140 = vector.broadcast %cst_97 : f32 to vector<32x32xf32>
    %141 = arith.mulf %140, %121 : vector<32x32xf32>
    %c0_98 = arith.constant 0 : index
    %c7_99 = arith.constant 7 : index
    %c0_100 = arith.constant 0 : index
    %c0_101 = arith.constant 0 : index
    %142 = vector.load %arg3[%c0_98, %c7_99, %c0_100, %c0_101] : memref<1x8x16x16xf32, #tpu.memory_space<vmem>>, vector<1x1x16x16xf32>
    %143 = vector.shape_cast %142 : vector<1x1x16x16xf32> to vector<16x16xf32>
    %cst_102 = arith.constant dense<0.000000e+00> : vector<16x32xf32>
    %144 = tpu.matmul %143, %4, %cst_102 {dimension_numbers = #tpu.dot_dimension_numbers<[1], [0], [0], [1], [0, 0, 1, 1], [], []>, precision = #tpu.contract_precision<fp32>} : vector<16x16xf32>, vector<16x32xf32>, vector<16x32xf32> -> vector<16x32xf32>
    %cst_103 = arith.constant dense<0.000000e+00> : vector<32x32xf32>
    %145 = tpu.matmul %5, %144, %cst_103 {dimension_numbers = #tpu.dot_dimension_numbers<[1], [0], [0], [1], [0, 0, 1, 1], [], []>, precision = #tpu.contract_precision<fp32>} : vector<32x16xf32>, vector<16x32xf32>, vector<32x32xf32> -> vector<32x32xf32>
    %cst_104 = arith.constant 5.000000e-01 : f32
    %146 = vector.broadcast %cst_104 : f32 to vector<32x32xf32>
    %147 = arith.mulf %146, %145 : vector<32x32xf32>
    %148 = arith.addf %141, %147 : vector<32x32xf32>
    %149 = arith.mulf %148, %6 : vector<32x32xf32>
    %150 = arith.addf %149, %16 : vector<32x32xf32>
    %c0_105 = arith.constant 0 : index
    %c10 = arith.constant 10 : index
    %c0_106 = arith.constant 0 : index
    %c0_107 = arith.constant 0 : index
    %151 = vector.load %arg6[%c0_105, %c10, %c0_106, %c0_107] : memref<1x32x32x32xf32, #tpu.memory_space<vmem>>, vector<1x1x32x32xf32>
    %152 = vector.shape_cast %151 : vector<1x1x32x32xf32> to vector<32x32xf32>
    %153 = vector.shape_cast %150 : vector<32x32xf32> to vector<1x1x32x32xf32>
    tpu.vector_store %arg6[%c0_105, %c10, %c0_106, %c0_107], %153 {strides = array<i32>} : memref<1x32x32x32xf32, #tpu.memory_space<vmem>>, vector<1x1x32x32xf32>,
    %154 = arith.mulf %145, %6 : vector<32x32xf32>
    %155 = arith.addf %154, %16 : vector<32x32xf32>
    %c0_108 = arith.constant 0 : index
    %c11 = arith.constant 11 : index
    %c0_109 = arith.constant 0 : index
    %c0_110 = arith.constant 0 : index
    %156 = vector.load %arg6[%c0_108, %c11, %c0_109, %c0_110] : memref<1x32x32x32xf32, #tpu.memory_space<vmem>>, vector<1x1x32x32xf32>
    %157 = vector.shape_cast %156 : vector<1x1x32x32xf32> to vector<32x32xf32>
    %158 = vector.shape_cast %155 : vector<32x32xf32> to vector<1x1x32x32xf32>
    tpu.vector_store %arg6[%c0_108, %c11, %c0_109, %c0_110], %158 {strides = array<i32>} : memref<1x32x32x32xf32, #tpu.memory_space<vmem>>, vector<1x1x32x32xf32>,
    %cst_111 = arith.constant 0.000000e+00 : f32
    %159 = vector.broadcast %cst_111 : f32 to vector<20x32x32xf32>
    %c0_112 = arith.constant 0 : index
    %c12 = arith.constant 12 : index
    %c0_113 = arith.constant 0 : index
    %c0_114 = arith.constant 0 : index
    %160 = vector.load %arg6[%c0_112, %c12, %c0_113, %c0_114] : memref<1x32x32x32xf32, #tpu.memory_space<vmem>>, vector<1x20x32x32xf32>
    %161 = vector.shape_cast %160 : vector<1x20x32x32xf32> to vector<20x32x32xf32>
    %162 = vector.shape_cast %159 : vector<20x32x32xf32> to vector<1x20x32x32xf32>
    tpu.vector_store %arg6[%c0_112, %c12, %c0_113, %c0_114], %162 {strides = array<i32>} : memref<1x32x32x32xf32, #tpu.memory_space<vmem>>, vector<1x20x32x32xf32>,
    return
  }
  func.func @transform_0(%arg0: i32, %arg1: i32) -> (i32, i32) {
    %c0_i32 = arith.constant 0 : i32
    %c0_i32_0 = arith.constant 0 : i32
    %c0_i32_1 = arith.constant 0 : i32
    return %c0_i32, %c0_i32_0 : i32, i32
  }
  func.func @transform_1(%arg0: i32, %arg1: i32) -> (i32, i32, i32, i32) {
    %c4_i32 = arith.constant 4 : i32
    %0 = arith.muli %arg0, %c4_i32 : i32
    %1 = arith.addi %0, %arg1 : i32
    %c0_i32 = arith.constant 0 : i32
    %c0_i32_0 = arith.constant 0 : i32
    %c0_i32_1 = arith.constant 0 : i32
    %c0_i32_2 = arith.constant 0 : i32
    return %1, %c0_i32, %c0_i32_0, %c0_i32_1 : i32, i32, i32, i32
  }
  func.func @transform_2(%arg0: i32, %arg1: i32) -> (i32, i32) {
    %c0_i32 = arith.constant 0 : i32
    %c0_i32_0 = arith.constant 0 : i32
    %c0_i32_1 = arith.constant 0 : i32
    return %c0_i32, %c0_i32_0 : i32, i32
  }
  func.func @transform_3(%arg0: i32, %arg1: i32) -> (i32, i32) {
    %c0_i32 = arith.constant 0 : i32
    %c0_i32_0 = arith.constant 0 : i32
    %c0_i32_1 = arith.constant 0 : i32
    return %c0_i32, %c0_i32_0 : i32, i32
  }
  func.func @transform_4(%arg0: i32, %arg1: i32) -> (i32, i32, i32, i32) {
    %c4_i32 = arith.constant 4 : i32
    %0 = arith.muli %arg0, %c4_i32 : i32
    %1 = arith.addi %0, %arg1 : i32
    %c0_i32 = arith.constant 0 : i32
    %c0_i32_0 = arith.constant 0 : i32
    %c0_i32_1 = arith.constant 0 : i32
    %c0_i32_2 = arith.constant 0 : i32
    return %1, %c0_i32, %c0_i32_0, %c0_i32_1 : i32, i32, i32, i32
  }
}

</mosaic_0001>

<bundles_post_ra>
// kernel: tpu_custom_call.1
= control target key start
LH: loop header
LB: loop body
LE: loop exit
PB: predicated region body
PF: predicated region fallthrough
CT: control target
= control target key end

     0   :  { %s13263_s0 = inlined_call_operand.vmem [shape: f32[4,2], index: 0, kind: input, shape index: {}]   ;;  %s13264_s1 = inlined_call_operand.hbm [shape: f32[8,8,16,16], index: 1, kind: input, shape index: {}]   ;;  %s13265_s2 = inlined_call_operand.hbm [shape: f32[16,32], index: 2, kind: input, shape index: {}]   ;;  %s13266_s3 = inlined_call_operand.vmem [shape: f32[32,16], index: 3, kind: input, shape index: {}]   ;;  %s13267_s4 = inlined_call_operand.hbm [shape: f32[8,32,32,32], index: 4, kind: output, shape index: {}]  }
   0x1   :  { %13278 = sst [smem:[#allocation16_spill]] %s13263_s0 }
   0x2   :  { %13279 = sst [smem:[#allocation17_spill]] %s13265_s2 }
   0x3   :  { %9 = vsyncpa [#allocation5], 0 }
   0x4   :  { %10 = vsyncpa [#allocation3], 0 }
   0x5   :  { %12 = vsyncpa [#allocation3 + $0x1], 0 }
   0x6   :  { %13 = vsyncpa [#allocation8], 0 }
   0x7   :  { %14 = vsyncpa [#allocation4], 0 }
   0x8   :  { %16 = vsyncpa [#allocation4 + $0x1], 0  ;;  %s11995_s15 = smov 0   ;;  %s11997_s16 = smov 0  }
   0x9   :  { %s11999_s17 = smov 0   ;;  %s12001_s18 = smov 0  }
   0xa   :  { %s12003_s19 = smov 0   ;;  %s12005_s20 = smov 0  }
   0xb   :  { %s12007_s21 = smov 0   ;;  %s12009_s22 = smov 0  }
   0xc LB: > { %13280 = sst [smem:[#allocation14_spill]] %s11951_s20  ;;  %s9590_s23 = sadd.s32 4294967295, %s11959_s22   ;;  %s11959_s22 = sphi %s12009_s22, %s22_s22   ;;  %s11955_s21 = sphi %s12007_s21, %s13307_s21   ;;  %s11951_s20 = sphi %s12005_s20, %s13306_s20   ;;  %s11947_s19 = sphi %s12003_s19, %s13302_s19   ;;  %s11943_s18 = sphi %s12001_s18, %s13301_s18   ;;  %s11939_s17 = sphi %s11999_s17, %s13305_s17   ;;  %s11935_s16 = sphi %s11997_s16, %s13304_s16   ;;  %s11931_s15 = sphi %s11995_s15, %s13303_s15  }
   0xd   : > { %13281 = sst [smem:[#allocation15_spill]] %s11955_s21  ;;  %s9591_s24 = sadd.s32 4294967294, %s11959_s22  }
   0xe   : > { %p73_p0 = scmp.ne.s32.totalorder %s11939_s17, %s11935_s16  ;;  %p74_p1 = scmp.eq.s32.totalorder %s11959_s22, 0 }
   0xf   : > { %p79_p2 = scmp.ne.s32.totalorder %s11935_s16, %s11931_s15  ;;  %p12042_p3 = scmp.eq.s32.totalorder %s9590_s23, 0 }
  0x10   : > { %p12046_p4 = por %p74_p1, %p73_p0  ;;  %p149_p5 = scmp.eq.s32.totalorder %s9590_s23, 7 }
  0x11   : > { %s13282_s25 = scalar_select %p12042_p3, 1, 0 }
  0x12   : > { %p12052_p6 = por %p12042_p3, %p79_p2  ;;  %p155_p7 = scmp.eq.s32.totalorder %s9591_s24, 7 }
  0x13   : > { %p12056_p8 = por %p149_p5, %p73_p0  ;;  %p9596_p9 = scmp.ge.s32.totalorder %s11959_s22, 1 }
  0x14   : > { %s13284_s27 = scalar_select %p12052_p6, 1, 0 }
  0x15   : > { %s13285_s28 = scalar_select %p12056_p8, 1, 0 }
  0x16   : > { %p12061_p10 = por %p155_p7, %p79_p2  ;;  %p162_p11 = scmp.lt.s32.totalorder %s11959_s22, 9 }
  0x17   : > { %s13287_s0 = sld [smem:[#allocation16_spill]]  ;;  %p11705_p0 = scmp.lt.s32.totalorder %s11959_s22, 8 }
  0x18   : > { %s13286_s29 = scalar_select %p12061_p10, 1, 0 }
  0x19   : > { %p12069_p12 = pnand %p9596_p9, %p162_p11  ;;  %p12084_p2 = pnand %p11705_p0, %p12046_p4 }
  0x1a   : > { %s11961_s10 = smov [#allocation7]  }
  0x1b   : > { %s13288_s7 = scalar_select %p12069_p12, 1, 0 }
  0x1c   : > { %p11688_p13 = pneg %p12069_p12  ;;  %s185_s11 = sshll.u32 %s11961_s10, 4  ;;  %s186_s11 = int_to_ptr.vmem [resolvable:$true] %s185_s11 }
  0x1d   : > { %s175_s6 = sshll.u32 %s13287_s0, 4  ;;  %s176_s6 = int_to_ptr.vmem [resolvable:$true] %s175_s6 }
  0x1e   : > { %p12078_p1 = pnand %p11688_p13, %p12042_p3  ;;  %s11780_s12 = scalar_lea.vmem %s176_s6, 64 }
  0x1f   : > { %s13290_s9 = scalar_select %p12084_p2, 1, 0 }
  0x20   : > { %p11781_p5 = scmp.ne.s32.totalorder %s176_s6, %s11780_s12  ;;  %p11782_p7 = pneg %p12078_p1 }
  0x21   : > { %p11788_p13 = scmp.lt.s32.totalorder %s176_s6, %s176_s6  ;;  %p11789_p10 = scmp.lt.s32.totalorder %s11780_s12, %s11780_s12 }
  0x22   : > { %p11783_p9 = pnand %p11782_p7, %p11781_p5 }
  0x23   : > { %p11790_p8 = por %p11789_p10, %p11788_p13 }
  0x24   : > { %p11784_p11 = pneg %p11783_p9 }
  0x26   : > { %p11791_p6 = pnand %p11790_p8, %p11784_p11 }
  0x28   : > { %11794 = shalt.err (!%p11791_p6)
}
  0x29   : > { %s11962_s13 = smov [#allocation2]   ;;  %s13291_s2 = sld [smem:[#allocation17_spill]] }
  0x2a   : > { %11691 = dma.vmem_to_smem (!%p12078_p1), %s176_s6, 64, %s11962_s13, [#allocation5]  }
  0x2f   : > { %s11795_s24 = scalar_lea.hbm %s13291_s2, 256 }
  0x30   : > { %p11796_p4 = scmp.ne.s32.totalorder %s13291_s2, %s11795_s24  ;;  %p11802_p6 = scmp.lt.u32.totalorder %s11795_s24, %s13291_s2 }
  0x32   : > { %p11798_p0 = pnand %p11796_p4, %p11782_p7 }
  0x34   : > { %p11799_p10 = pneg %p11798_p0 }
  0x36   : > { %p11804_p8 = pnand %p11802_p6, %p11799_p10 }
  0x38   : > { %11807 = shalt.err (!%p11804_p8)
}
  0x39   : > { %s11808_s6 = scalar_lea.vmem %s186_s11, 256  ;;  %p11816_p13 = scmp.lt.s32.totalorder %s186_s11, %s186_s11 }
  0x3a   : > { %p11809_p5 = scmp.ne.s32.totalorder %s186_s11, %s11808_s6  ;;  %p11817_p3 = scmp.lt.s32.totalorder %s11808_s6, %s11808_s6 }
  0x3c   : > { %p11811_p9 = pnand %p11809_p5, %p11782_p7  ;;  %p11818_p12 = por %p11817_p3, %p11816_p13 }
  0x3e   : > { %p11812_p11 = pneg %p11811_p9 }
  0x40   : > { %p11819_p2 = pnand %p11818_p12, %p11812_p11 }
  0x42   : > { %11822 = shalt.err (!%p11819_p2)
}
  0x43   : > { %s13274_s12 = smov 128   ;;  %s13275_s13 = smov 8  }
  0x44   : > { %11694 = dma.hbm_to_vmem [thread:$0]  (!%p12078_p1), %s13291_s2, 256, %s186_s11, [#allocation8], %s13274_s12, %s13274_s12, %s13275_s13  }
  0x45   : > { %s31_s24 = sadd.s32 1, %s11951_s20  ;;  %s34_s26 = sadd.s32 1, %s11955_s21 }
  0x46   : > { %p32_p3 = scmp.ge.s32.totalorder %s31_s24, 4  ;;  %s9592_s30 = sshll.u32 %s11955_s21, 2 }
  0x47   : > { %s60_s5 = sadd.s32 %s11951_s20, %s9592_s30  ;;  %s202_s10 = sand.u32 1, %s11939_s17  }
  0x48   : > { %s13309_s24 = smov (%p32_p3, %s31_s24), 0  ;;  %s13311_s26 = smov (!%p32_p3, %s34_s26), %s11955_s21 }
  0x49   : > { %p36_p12 = scmp.ge.s32.totalorder %s13311_s26, 2  ;;  %s9600_s8 = sshll.u32 %s202_s10, 7 }
  0x4a   : > { %s9754_s6 = sshll.u32 %s60_s5, 11  ;;  %s206_s13 = scalar_lea.vmem [#allocation6], %s9600_s8 }
  0x4b   : > { %s13313_s26 = smov (%p36_p12, %s13311_s26), 0  ;;  %s12131_s23 = scalar_lea.hbm %s13264_s1, %s9754_s6 }
  0x4c   : > { %s9593_s12 = sshll.u32 %s13313_s26, 2  ;;  %s215_s30 = sshll.u32 %s206_s13, 4  ;;  %s12135_s30 = int_to_ptr.vmem [resolvable:$true] %s215_s30 }
  0x4d   : > { %s62_s0 = sadd.s32 %s9593_s12, %s13309_s24  ;;  %s66_s21 = sadd.s32 1, %s11939_s17 }
  0x4e   : > { %s63_s2 = ssub.s32 %s60_s5, %s62_s0  ;;  %s12142_s14 = scalar_lea.sflag [#allocation3], %s202_s10 }
  0x4f   : > { %p12138_p1 = scmp.eq.s32.totalorder %s63_s2, 0  ;;  %s11823_s6 = scalar_lea.hbm %s12131_s23, 2048 }
  0x50   : > { %p11824_p2 = scmp.ne.s32.totalorder %s12131_s23, %s11823_s6  ;;  %p13293_p7 = scmp.ne.s32.totalorder %s13290_s9, 0 }
  0x51   : > { %s11828_s8 = scalar_lea.hbm %s13264_s1, 16384  ;;  %p11829_p6 = scmp.lt.u32.totalorder %s12131_s23, %s13264_s1 }
  0x52   : > { %p11825_p4 = pneg %p13293_p7  ;;  %p11830_p8 = scmp.lt.u32.totalorder %s11828_s8, %s11823_s6 }
  0x53   : > { %p11832_p9 = scmp.lt.u32.totalorder %s11823_s6, %s12131_s23 }
  0x54   : > { %p11826_p0 = pnand %p11825_p4, %p11824_p2  ;;  %p11831_p5 = por %p11830_p8, %p11829_p6 }
  0x56   : > { %p11827_p10 = pneg %p11826_p0  ;;  %p11833_p11 = por %p11832_p9, %p11831_p5 }
  0x58   : > { %p11834_p13 = pnand %p11833_p11, %p11827_p10 }
  0x5a   : > { %11837 = shalt.err (!%p11834_p13)
}
  0x5b   : > { %s11838_s2 = scalar_lea.vmem %s12135_s30, 2048  ;;  %s11965_s10 = smov [#allocation6]  }
  0x5c   : > { %p11839_p3 = scmp.ne.s32.totalorder %s12135_s30, %s11838_s2  ;;  %s11843_s11 = sshll.u32 %s11965_s10, 4  ;;  %s11844_s11 = int_to_ptr.vmem [resolvable:$false] %s11843_s11 }
  0x5d   : > { %s11845_s13 = scalar_lea.vmem %s11844_s11, 4096  ;;  %p11846_p0 = scmp.lt.s32.totalorder %s12135_s30, %s11844_s11 }
  0x5e   : > { %p11841_p12 = pnand %p11839_p3, %p11825_p4  ;;  %p11847_p6 = scmp.lt.s32.totalorder %s11845_s13, %s11838_s2 }
  0x60   : > { %p11842_p2 = pneg %p11841_p12  ;;  %p11848_p8 = por %p11847_p6, %p11846_p0 }
  0x62   : > { %p11849_p5 = pnand %p11848_p8, %p11842_p2 }
  0x64   : > { %11852 = shalt.err (!%p11849_p5)
}
  0x65   : > { %s13294_s6 = smov 8   ;;  %s13295_s12 = smov 128  }
  0x66   : > { %11698 = dma.hbm_to_vmem [thread:$0]  (!%p13293_p7), %s12131_s23, 2048, %s12135_s30, %s12142_s14, %s13295_s12, %s13295_s12, %s13294_s6  }
  0x67   : > { %s12178_s8 = scalar_select %p12138_p1, %s11939_s17, %s66_s21  }
  0x68   : > { %p13296_p4 = scmp.ne.s32.totalorder %s13288_s7, 0 }
  0x69   : > { %p13297_p10 = scmp.ne.s32.totalorder (!%p13296_p4), %s13282_s25, 0 }
  0x6a   : > { %227 = sbr.rel (%p13296_p4) target bundleno = 1632 (0x660), region = 36 }
  0x71   : > { %11914 = dma.done.wait (%p13297_p10), [#allocation5], 64  }
  0x72   : > { %11916 = vsyncadd (%p13297_p10), [#allocation5], 4294967232  ;;  %s12187_s9 = sand.u32 1, %s11935_s16   ;;  %p13298_p1 = scmp.ne.s32.totalorder %s13284_s27, 0 }
  0x73   : > { %s9606_s23 = sshll.u32 %s12187_s9, 7  ;;  %s234_s30 = scalar_lea.sflag [#allocation3], %s12187_s9 }
  0x74   : > { %s12191_s20 = scalar_lea.vmem [#allocation6], %s9606_s23 }
  0x75   : > { %11918 = dma.done.wait (%p13298_p1), %s234_s30, 2048  }
  0x76   : > { %11920 = vsyncadd (%p13298_p1), %s234_s30, 4294965248 }
  0x77   : > { %11922 = dma.done.wait (%p13297_p10), [#allocation8], 256  }
  0x78   : > { %11924 = vsyncadd (%p13297_p10), [#allocation8], 4294967040 }
  0x79   : > { %246 = sfence }
  0x7a   : > { %v275_v0 = vld [vmem:[#allocation7] sm:$0xff]  ;;  %v276_v1 = vld [vmem:[#allocation7 + $0x8] sm:$0xff]  ;;  %vm305_vm0 = vcmask 130048   ;;  %v9610_v30 = vld [vmem:[%s12191_s20 + $0x10] sm:$0xff]  ;;  %s9609_s10 = sshll.u32 %s11943_s18, 7  ;;  %s9608_s12 = sshll.u32 %s12187_s9, 10 }
  0x7b   : > { %v303_v2 = vld [vmem:[%s12191_s20] sm:$0xff]  ;;  %v313_v3 = vand.u32 4294901760, %v275_v0  ;;  %v316_v4 = vand.u32 4294901760, %v276_v1  ;;  %v304_v6 = vld [vmem:[%s12191_s20 + $0x8] sm:$0xff]  ;;  %v1435_v31 = vsel %vm305_vm0, %v9610_v30, 0  ;;  %v9611_v32 = vld [vmem:[%s12191_s20 + $0x18] sm:$0xff] }
  0x7c   : > { %v307_v5 = vsel %vm305_vm0, %v303_v2, 0  ;;  %v310_v8 = vsel %vm305_vm0, %v304_v6, 0  ;;  %v1507_v33 = vand.u32 4294901760, %v1435_v31  ;;  %v1438_v34 = vsel %vm305_vm0, %v9611_v32, 0  ;;  %v277_v44 = vld [vmem:[%s13266_s3] sm:$0xff]  ;;  %v278_v51 = vld [vmem:[%s13266_s3 + $0x8] sm:$0xff] }
  0x7d   : > { %v379_v7 = vand.u32 4294901760, %v307_v5  ;;  %v12205_v9 = vpack.c.bf16 %v316_v4, %v313_v3  ;;  %v389_v10 = vand.u32 4294901760, %v310_v8  ;;  %v401_v11 = vsub.f32 %v275_v0, %v313_v3  ;;  %v279_v52 = vld [vmem:[%s13266_s3 + $0x10] sm:$0xff]  ;;  %v280_v55 = vld [vmem:[%s13266_s3 + $0x18] sm:$0xff]  ;;  %s273_s11 = sadd.s32 1, %s9609_s10  ;;  %s272_s6 = sld [smem:[#allocation2 + %s9609_s10]] }
  0x7e   : > { %v408_v12 = vsub.f32 %v276_v1, %v316_v4  ;;  %v1517_v35 = vand.u32 4294901760, %v1438_v34  ;;  %v1508_v36 = vsub.f32 %v1435_v31, %v1507_v33  ;;  %v815_v45 = vsel %vm305_vm0, %v277_v44, 0  ;;  %v9627_v44 = vld [vmem:[%s12191_s20 + $0x38] sm:$0xff]  ;;  %s274_s13 = sld [smem:[#allocation2 + %s273_s11]]  ;;  %s12421_s23 = scalar_lea.vmem [#allocation9], %s9608_s12 }
  0x7f   : > { %v380_v13 = vsub.f32 %v307_v5, %v379_v7  ;;  %11053 = vmatprep.subr.bf16.mxu0 %v12205_v9  ;;  %v390_v14 = vsub.f32 %v310_v8, %v389_v10  ;;  %v402_v15 = vand.u32 4294901760, %v401_v11  ;;  %v12245_v46 = vand.u32 4294901760, %v815_v45  ;;  %s9749_s30 = sshll.u32 %s11947_s19, 2  ;;  %s9465_s7 = scalar_lea.sflag [#allocation4], %s12187_s9 }
  0x80   : > { %v409_v16 = vand.u32 4294901760, %v408_v12  ;;  %11055 = vmatpush3.bf16.msra.mxu0 %v12205_v9  ;;  %v12211_v28 = vpack.c.bf16 %v408_v12, %v401_v11  ;;  %v1518_v37 = vsub.f32 %v1438_v34, %v1517_v35  ;;  %v1509_v38 = vand.u32 4294901760, %v1508_v36  ;;  %s9473_s19 = sadd.s32 %s11943_s18, %s9749_s30  ;;  %p13299_p9 = scmp.ne.s32.totalorder %s13285_s28, 0 }
  0x81   : > { %v381_v17 = vand.u32 4294901760, %v380_v13  ;;  %v391_v18 = vand.u32 4294901760, %v390_v14  ;;  %v403_v19 = vsub.f32 %v401_v11, %v402_v15  ;;  %v12248_v47 = vsub.f32 %v815_v45, %v12245_v46  ;;  %v9616_v45 = vld [vmem:[%s12191_s20 + $0x20] sm:$0xff]  ;;  %s9755_s18 = sshll.u32 %s9473_s19, 14  ;;  %s11967_s0 = smov [#allocation9]  }
  0x82   : > { %v410_v20 = vsub.f32 %v408_v12, %v409_v16  ;;  %v12218_v29 = vpack.c.bf16 %v409_v16, %v402_v15  ;;  %v1519_v39 = vand.u32 4294901760, %v1518_v37  ;;  %v1510_v40 = vsub.f32 %v1508_v36, %v1509_v38  ;;  %s13200_s27 = scalar_lea.hbm %s13267_s4, %s9755_s18  ;;  %s11857_s5 = sshll.u32 %s11967_s0, 4  ;;  %s11858_s5 = int_to_ptr.vmem [resolvable:$false] %s11857_s5 }
  0x83   : > { %v382_v21 = vsub.f32 %v380_v13, %v381_v17  ;;  %v392_v22 = vsub.f32 %v390_v14, %v391_v18  ;;  %v404_v23 = vand.u32 4294901760, %v403_v19  ;;  %v12251_v48 = vand.u32 4294901760, %v12248_v47  ;;  %s11859_s2 = scalar_lea.vmem %s11858_s5, 32768 }
  0x84   : > { %v411_v24 = vand.u32 4294901760, %v410_v20  ;;  %v1520_v41 = vsub.f32 %v1518_v37, %v1519_v39  ;;  %v1511_v42 = vand.u32 4294901760, %v1510_v40  ;;  %v818_v53 = vsel %vm305_vm0, %v278_v51, 0 }
  0x85   : > { %v383_v25 = vand.u32 4294901760, %v382_v21  ;;  %v393_v26 = vand.u32 4294901760, %v392_v22  ;;  %v896_v49 = vsub.f32 %v12248_v47, %v12251_v48  ;;  %v821_v54 = vsel %vm305_vm0, %v279_v52, 0 }
  0x86   : > { %v12209_v27 = vpack.c.bf16 %v411_v24, %v404_v23  ;;  %v1521_v43 = vand.u32 4294901760, %v1520_v41  ;;  %v12270_v56 = vand.u32 4294901760, %v818_v53  ;;  %v12272_v57 = vand.u32 4294901760, %v821_v54 }
  0x87   : > { %10240 = vmatprep.mubr.f32.mxu0 %v383_v25  ;;  %v12256_v50 = vand.u32 4294901760, %v896_v49  ;;  %v824_v58 = vsel %vm305_vm0, %v280_v55, 0  ;;  %v9617_v55 = vld [vmem:[%s12191_s20 + $0x28] sm:$0xff]  ;;  %vm1422_vm2 = vcmask 261120  }
  0x88   : > { %10241 = vmatmul.mubr.f32.vlgmr.msra.gmra.mrb[0].mxu0 %v393_v26  ;;  %11057 = vmatprep.subr.bf16.mxu0 %v12209_v27  ;;  %v12276_v59 = vsub.f32 %v818_v53, %v12270_v56  ;;  %v12278_v60 = vand.u32 4294901760, %v824_v58  ;;  %v12281_v61 = vsub.f32 %v821_v54, %v12272_v57  ;;  %v3711_v53 = vsel %vm305_vm0, %v9627_v44, 0 }
  0x89   : > { %11059 = vmatpush3.bf16.msra.mxu0 %v12209_v27  ;;  %10247 = vmatprep.mubr.f32.mxu0 %v379_v7  ;;  %v2559_v54 = vsel %vm305_vm0, %v9616_v45, 0 }
  0x8a   : > { %11061 = vmatprep.subr.bf16.mxu0 %v12211_v28  ;;  %10282 = vmatprep.mubr.f32.mxu1 %v12256_v50  ;;  %v12284_v62 = vand.u32 4294901760, %v12276_v59  ;;  %v12287_v63 = vsub.f32 %v824_v58, %v12278_v60  ;;  %v12290_v0 = vand.u32 4294901760, %v12281_v61  ;;  %v12344_v58 = vand.u32 4294901760, %v3711_v53 }
  0x8c   : > { %v906_v5 = vsub.f32 %v12276_v59, %v12284_v62  ;;  %v12295_v6 = vand.u32 4294901760, %v12287_v63  ;;  %v916_v8 = vsub.f32 %v12281_v61, %v12290_v0 }
  0x8e   : > { %v926_v15 = vsub.f32 %v12287_v63, %v12295_v6 }
  0x90   : > { %10248 = vmatmul.mubr.f32.vlgmr.msra.gmra.mrb[0].mxu0 %v389_v10  ;;  %v12306_v22 = vand.u32 4294901760, %v926_v15 }
  0x91   : > { %11063 = vmatpush3.bf16.msra.mxu0 %v12211_v28  ;;  %10254 = vmatprep.mubr.f32.mxu0 %v380_v13 }
  0x92   : > { %11065 = vmatprep.subr.bf16.mxu0 %v12205_v9 }
  0x98   : > { %10255 = vmatmul.mubr.f32.vlgmr.msra.gmra.mrb[0].mxu0 %v390_v14  ;;  %v12299_v14 = vand.u32 4294901760, %v906_v5  ;;  %v3791_v5 = vsub.f32 %v3711_v53, %v12344_v58 }
  0x99   : > { %11067 = vmatpush3.bf16.msra.mxu0 %v12205_v9  ;;  %10261 = vmatprep.mubr.f32.mxu0 %v381_v17 }
  0x9a   : > { %11069 = vmatprep.subr.bf16.mxu0 %v12218_v29 }
  0xa0   : > { %10262 = vmatmul.mubr.f32.vlgmr.msra.gmra.mrb[0].mxu0 %v391_v18  ;;  %v12303_v18 = vand.u32 4294901760, %v916_v8 }
  0xa1   : > { %11071 = vmatpush3.bf16.msra.mxu0 %v12218_v29  ;;  %10268 = vmatprep.mubr.f32.mxu0 %v379_v7 }
  0xa2   : > { %11073 = vmatprep.subr.bf16.mxu0 %v12205_v9 }
  0xa8   : > { %10269 = vmatmul.mubr.f32.vlgmr.msra.gmra.mrb[0].mxu0 %v389_v10 }
  0xa9   : > { %11075 = vmatpush3.bf16.msra.mxu0 %v12205_v9  ;;  %10275 = vmatprep.mubr.f32.mxu0 %v379_v7 }
  0xaa   : > { %11101 = vmatprep.subr.bf16.mxu0 %v12205_v9 }
  0xb0   : > { %10276 = vmatmul.mubr.f32.vlgmr.msra.gmra.mrb[0].mxu0 %v389_v10 }
  0xb1   : > { %11103 = vmatpush3.bf16.msra.mxu0 %v12205_v9  ;;  %10342 = vmatprep.mubr.f32.mxu0 %v1511_v42 }
  0xb2   : > { %11105 = vmatprep.subr.bf16.mxu0 %v12209_v27 }
  0xb4   : > { %10343 = vmatmul.mubr.f32.vlgmr.msra.gmra.mrb[2].mxu0 %v1521_v43 }
  0xb5   : > { %11107 = vmatpush3.bf16.msra.mxu0 %v12209_v27  ;;  %10349 = vmatprep.mubr.f32.mxu0 %v1507_v33 }
  0xb6   : > { %11109 = vmatprep.subr.bf16.mxu0 %v12211_v28 }
  0xbc   : > { %10350 = vmatmul.mubr.f32.vlgmr.msra.gmra.mrb[2].mxu0 %v1517_v35 }
  0xbd   : > { %11111 = vmatpush3.bf16.msra.mxu0 %v12211_v28  ;;  %10356 = vmatprep.mubr.f32.mxu0 %v1508_v36 }
  0xbe   : > { %11113 = vmatprep.subr.bf16.mxu0 %v12205_v9 }
  0xc4   : > { %10357 = vmatmul.mubr.f32.vlgmr.msra.gmra.mrb[2].mxu0 %v1518_v37 }
  0xc5   : > { %11115 = vmatpush3.bf16.msra.mxu0 %v12205_v9  ;;  %10363 = vmatprep.mubr.f32.mxu0 %v1509_v38  ;;  %v9626_v38 = vld [vmem:[%s12191_s20 + $0x30] sm:$0xff] }
  0xc6   : > { %11117 = vmatprep.subr.bf16.mxu0 %v12218_v29  ;;  %v3708_v43 = vsel %vm305_vm0, %v9626_v38, 0 }
  0xc7   : > { %v12337_v52 = vand.u32 4294901760, %v3708_v43 }
  0xcc   : > { %10364 = vmatmul.mubr.f32.vlgmr.msra.gmra.mrb[2].mxu0 %v1519_v39 }
  0xcd   : > { %11119 = vmatpush3.bf16.msra.mxu0 %v12218_v29  ;;  %10370 = vmatprep.mubr.f32.mxu0 %v1507_v33 }
  0xce   : > { %11121 = vmatprep.subr.bf16.mxu0 %v12205_v9 }
  0xd4   : > { %10371 = vmatmul.mubr.f32.vlgmr.msra.gmra.mrb[2].mxu0 %v1517_v35 }
  0xd5   : > { %11123 = vmatpush3.bf16.msra.mxu0 %v12205_v9  ;;  %10377 = vmatprep.mubr.f32.mxu0 %v1507_v33 }
  0xdc   : > { %10378 = vmatmul.mubr.f32.vlgmr.msra.gmra.mrb[2].mxu0 %v1517_v35 }
  0xdd   : > { %10414 = vmatprep.mubr.f32.mxu0 %v12251_v48 }
 0x183   : > { %v10277_v1 = vpop.f32.mrb[0].mxu0 }
 0x184   : > { %v830_v2 = vand.u32 4294901760, %v10277_v1  ;;  %v804_v3 = vpop.f32.mrb[1].mxu0 }
 0x185   : > { %v827_v4 = vand.u32 4294901760, %v804_v3 }
 0x186   : > { %v942_v7 = vsub.f32 %v10277_v1, %v830_v2  ;;  %v12346_v1 = vand.u32 4294901760, %v2559_v54 }
 0x187   : > { %v11076_v10 = vpack.c.bf16 %v830_v2, %v827_v4  ;;  %v935_v11 = vsub.f32 %v804_v3, %v827_v4  ;;  %v2562_v2 = vsel %vm305_vm0, %v9617_v55, 0  ;;  %v3781_v3 = vsub.f32 %v3708_v43, %v12337_v52 }
 0x188   : > { %v943_v12 = vand.u32 4294901760, %v942_v7  ;;  %v12353_v4 = vand.u32 4294901760, %v2562_v2 }
 0x189   : > { %v936_v13 = vand.u32 4294901760, %v935_v11  ;;  %11077 = vmatprep.subr.bf16.mxu1 %v11076_v10  ;;  %v11084_v16 = vpack.c.bf16 %v942_v7, %v935_v11  ;;  %v3782_v8 = vand.u32 4294901760, %v3781_v3 }
 0x18a   : > { %v944_v17 = vsub.f32 %v942_v7, %v943_v12  ;;  %11079 = vmatpush3.bf16.msra.mxu1 %v11076_v10  ;;  %v2632_v7 = vsub.f32 %v2559_v54, %v12346_v1 }
 0x18b   : > { %v937_v19 = vsub.f32 %v935_v11, %v936_v13  ;;  %v11092_v20 = vpack.c.bf16 %v943_v12, %v936_v13  ;;  %v3792_v11 = vand.u32 4294901760, %v3791_v5  ;;  %v3783_v13 = vsub.f32 %v3781_v3, %v3782_v8 }
 0x18c   : > { %v945_v21 = vand.u32 4294901760, %v944_v17  ;;  %v2633_v12 = vand.u32 4294901760, %v2632_v7 }
 0x18d   : > { %10283 = vmatmul.mubr.f32.vlgmr.msra.gmra.mrb[0].mxu1 %v12299_v14  ;;  %v938_v23 = vand.u32 4294901760, %v937_v19  ;;  %v3784_v19 = vand.u32 4294901760, %v3783_v13 }
 0x18e   : > { %10285 = vmatprep.mubr.f32.mxu1 %v12303_v18  ;;  %v2634_v17 = vsub.f32 %v2632_v7, %v2633_v12 }
 0x18f   : > { %v11080_v24 = vpack.c.bf16 %v945_v21, %v938_v23 }
 0x190   : > { %v2635_v23 = vand.u32 4294901760, %v2634_v17 }
 0x191   : > { %10286 = vmatmul.mubr.f32.gmra.mrb[2].mxu1 %v12306_v22  ;;  %11081 = vmatprep.subr.bf16.mxu1 %v11080_v24 }
 0x192   : > { %11083 = vmatpush3.bf16.msra.mxu1 %v11080_v24  ;;  %10292 = vmatprep.mubr.f32.mxu1 %v12245_v46 }
 0x193   : > { %11085 = vmatprep.subr.bf16.mxu1 %v11084_v16 }
 0x195   : > { %10293 = vmatmul.mubr.f32.vlgmr.msra.gmra.mrb[0].mxu1 %v12270_v56 }
 0x196   : > { %11087 = vmatpush3.bf16.msra.mxu1 %v11084_v16  ;;  %10295 = vmatprep.mubr.f32.mxu1 %v12272_v57  ;;  %v3793_v16 = vsub.f32 %v3791_v5, %v3792_v11 }
 0x197   : > { %11089 = vmatprep.subr.bf16.mxu1 %v11076_v10 }
 0x198   : > { %v3794_v21 = vand.u32 4294901760, %v3793_v16 }
 0x199   : > { %10296 = vmatmul.mubr.f32.gmra.mrb[2].mxu1 %v12278_v60 }
 0x19a   : > { %10302 = vmatprep.mubr.f32.mxu1 %v12248_v47 }
 0x19d   : > { %10303 = vmatmul.mubr.f32.vlgmr.msra.gmra.mrb[0].mxu1 %v12276_v59 }
 0x19e   : > { %11091 = vmatpush3.bf16.msra.mxu1 %v11076_v10  ;;  %10305 = vmatprep.mubr.f32.mxu1 %v12281_v61 }
 0x19f   : > { %11093 = vmatprep.subr.bf16.mxu1 %v11092_v20 }
 0x1a1   : > { %10306 = vmatmul.mubr.f32.gmra.mrb[2].mxu1 %v12287_v63 }
 0x1a2   : > { %10312 = vmatprep.mubr.f32.mxu1 %v12251_v48 }
 0x1a5   : > { %10313 = vmatmul.mubr.f32.vlgmr.msra.gmra.mrb[0].mxu1 %v12284_v62 }
 0x1a6   : > { %11095 = vmatpush3.bf16.msra.mxu1 %v11092_v20  ;;  %10315 = vmatprep.mubr.f32.mxu1 %v12290_v0 }
 0x1a7   : > { %11097 = vmatprep.subr.bf16.mxu1 %v11076_v10 }
 0x1a9   : > { %10316 = vmatmul.mubr.f32.gmra.mrb[2].mxu1 %v12295_v6 }
 0x1aa   : > { %10322 = vmatprep.mubr.f32.mxu1 %v12245_v46 }
 0x1ad   : > { %10323 = vmatmul.mubr.f32.vlgmr.msra.gmra.mrb[0].mxu1 %v12270_v56 }
 0x1ae   : > { %11099 = vmatpush3.bf16.msra.mxu1 %v11076_v10  ;;  %10325 = vmatprep.mubr.f32.mxu1 %v12272_v57  ;;  %v2642_v10 = vsub.f32 %v2562_v2, %v12353_v4 }
 0x1af   : > { %v10379_v25 = vpop.f32.mrb[2].mxu0 }
 0x1b0   : > { %v1946_v26 = vand.u32 4294901760, %v10379_v25  ;;  %v1932_v30 = vpop.f32.mrb[3].mxu0  ;;  %v2643_v15 = vand.u32 4294901760, %v2642_v10 }
 0x1b1   : > { %v1943_v31 = vand.u32 4294901760, %v1932_v30  ;;  %10326 = vmatmul.mubr.f32.gmra.mrb[2].mxu1 %v12278_v60 }
 0x1b2   : > { %v2058_v32 = vsub.f32 %v10379_v25, %v1946_v26  ;;  %10332 = vmatprep.mubr.f32.mxu1 %v12245_v46  ;;  %v2644_v20 = vsub.f32 %v2642_v10, %v2643_v15  ;;  %v287_v25 = vlaneseq }
 0x1b3   : > { %v11124_v33 = vpack.c.bf16 %v1946_v26, %v1943_v31  ;;  %v2051_v34 = vsub.f32 %v1932_v30, %v1943_v31  ;;  %v298_v30 = vstv %s274_s13  ;;  %v12412_v31 = vstv %s272_s6 }
 0x1b4   : > { %v2059_v35 = vand.u32 4294901760, %v2058_v32  ;;  %v2645_v24 = vand.u32 4294901760, %v2644_v20  ;;  %v288_v26 = vand.u32 127, %v287_v25 }
 0x1b5   : > { %10333 = vmatmul.mubr.f32.vlgmr.msra.gmra.mrb[0].mxu1 %v12270_v56  ;;  %11125 = vmatprep.subr.bf16.mxu1 %v11124_v33  ;;  %v2052_v36 = vand.u32 4294901760, %v2051_v34  ;;  %v11132_v37 = vpack.c.bf16 %v2058_v32, %v2051_v34 }
 0x1b6   : > { %11137 = vmatprep.subr.bf16.mxu0 %v11124_v33  ;;  %11127 = vmatpush3.bf16.msra.mxu1 %v11124_v33  ;;  %v2060_v39 = vsub.f32 %v2058_v32, %v2059_v35  ;;  %vm293_vm1 = vcmp.lt.s32.totalorder %v288_v26, 24 }
 0x1b7   : > { %11139 = vmatpush3.bf16.msra.mxu0 %v11124_v33  ;;  %10335 = vmatprep.mubr.f32.mxu1 %v12272_v57  ;;  %v11140_v40 = vpack.c.bf16 %v2059_v35, %v2052_v36  ;;  %v2053_v41 = vsub.f32 %v2051_v34, %v2052_v36  ;;  %v12415_v32 = vsel %vm293_vm1, %v298_v30, 0.0 }
 0x1b8   : > { %v2061_v42 = vand.u32 4294901760, %v2060_v39 }
 0x1b9   : > { %10336 = vmatmul.mubr.f32.gmra.mrb[2].mxu1 %v12278_v60  ;;  %11141 = vmatprep.subr.bf16.mxu0 %v11140_v40  ;;  %v2054_v49 = vand.u32 4294901760, %v2053_v41 }
 0x1ba   : > { %10415 = vmatmul.mubr.f32.vlgmr.msra.gmra.mrb[4].mxu0 %v12284_v62  ;;  %10384 = vmatprep.mubr.f32.mxu1 %v12256_v50 }
 0x1bb   : > { %11143 = vmatpush3.bf16.msra.mxu0 %v11140_v40  ;;  %10417 = vmatprep.mubr.f32.mxu0 %v12290_v0  ;;  %v11128_v51 = vpack.c.bf16 %v2061_v42, %v2054_v49 }
 0x1bc   : > { %11145 = vmatprep.subr.bf16.mxu0 %v11124_v33 }
 0x1bd   : > { %10385 = vmatmul.mubr.f32.vlgmr.msra.gmra.mrb[4].mxu1 %v12299_v14  ;;  %11129 = vmatprep.subr.bf16.mxu1 %v11128_v51 }
 0x1be   : > { %10418 = vmatmul.mubr.f32.gmra.mrb[6].mxu0 %v12295_v6  ;;  %11131 = vmatpush3.bf16.msra.mxu1 %v11128_v51 }
 0x1bf   : > { %11133 = vmatprep.subr.bf16.mxu1 %v11132_v37  ;;  %10387 = vmatprep.mubr.f32.mxu1 %v12303_v18 }
 0x1c0   : > { %10424 = vmatprep.mubr.f32.mxu0 %v12245_v46 }
 0x1c1   : > { %10388 = vmatmul.mubr.f32.gmra.mrb[6].mxu1 %v12306_v22 }
 0x1c2   : > { %10425 = vmatmul.mubr.f32.vlgmr.msra.gmra.mrb[4].mxu0 %v12270_v56  ;;  %10394 = vmatprep.mubr.f32.mxu1 %v12245_v46 }
 0x1c3   : > { %11147 = vmatpush3.bf16.msra.mxu0 %v11124_v33  ;;  %10427 = vmatprep.mubr.f32.mxu0 %v12272_v57 }
 0x1c4   : > { %11197 = vmatprep.subr.bf16.mxu0 %v12205_v9 }
 0x1c5   : > { %10395 = vmatmul.mubr.f32.vlgmr.msra.gmra.mrb[4].mxu1 %v12270_v56 }
 0x1c6   : > { %11135 = vmatpush3.bf16.msra.mxu1 %v11132_v37  ;;  %10428 = vmatmul.mubr.f32.gmra.mrb[6].mxu0 %v12278_v60 }
 0x1c7   : > { %10397 = vmatprep.mubr.f32.mxu1 %v12272_v57  ;;  %10434 = vmatprep.mubr.f32.mxu0 %v12245_v46 }
 0x1c8   : > { %11149 = vmatprep.subr.bf16.mxu1 %v12205_v9 }
 0x1c9   : > { %10398 = vmatmul.mubr.f32.gmra.mrb[6].mxu1 %v12278_v60 }
 0x1ca   : > { %10435 = vmatmul.mubr.f32.vlgmr.msra.gmra.mrb[4].mxu0 %v12270_v56  ;;  %10404 = vmatprep.mubr.f32.mxu1 %v12248_v47 }
 0x1cb   : > { %10437 = vmatprep.mubr.f32.mxu0 %v12272_v57  ;;  %11199 = vmatpush3.bf16.msra.mxu0 %v12205_v9 }
 0x1cc   : > { %11201 = vmatprep.subr.bf16.mxu0 %v12209_v27 }
 0x1cd   : > { %10405 = vmatmul.mubr.f32.vlgmr.msra.gmra.mrb[4].mxu1 %v12276_v59 }
 0x1ce   : > { %10438 = vmatmul.mubr.f32.gmra.mrb[6].mxu0 %v12278_v60  ;;  %10407 = vmatprep.mubr.f32.mxu1 %v12281_v61 }
 0x1cf   : > { %10546 = vmatprep.mubr.f32.mxu0 %v3784_v19  ;;  %11151 = vmatpush3.bf16.msra.mxu1 %v12205_v9 }
 0x1d0   : > { %11153 = vmatprep.subr.bf16.mxu1 %v12209_v27 }
 0x1d1   : > { %10408 = vmatmul.mubr.f32.gmra.mrb[6].mxu1 %v12287_v63 }
 0x1d2   : > { %10547 = vmatmul.mubr.f32.vlgmr.msra.gmra.mrb[8].mxu0 %v3794_v21  ;;  %10444 = vmatprep.mubr.f32.mxu1 %v2635_v23 }
 0x1d3   : > { %11203 = vmatpush3.bf16.msra.mxu0 %v12209_v27  ;;  %10553 = vmatprep.mubr.f32.mxu0 %v12337_v52 }
 0x1d4   : > { %11205 = vmatprep.subr.bf16.mxu0 %v12211_v28 }
 0x1d5   : > { %10445 = vmatmul.mubr.f32.vlgmr.msra.gmra.mrb[8].mxu1 %v2645_v24 }
 0x1d6   : > { %11155 = vmatpush3.bf16.msra.mxu1 %v12209_v27  ;;  %10451 = vmatprep.mubr.f32.mxu1 %v12346_v1 }
 0x1d7   : > { %11157 = vmatprep.subr.bf16.mxu1 %v12211_v28 }
 0x1da   : > { %10554 = vmatmul.mubr.f32.vlgmr.msra.gmra.mrb[8].mxu0 %v12344_v58 }
 0x1db   : > { %11207 = vmatpush3.bf16.msra.mxu0 %v12211_v28  ;;  %10560 = vmatprep.mubr.f32.mxu0 %v3781_v3 }
 0x1dc   : > { %11209 = vmatprep.subr.bf16.mxu0 %v12205_v9 }
 0x1dd   : > { %10452 = vmatmul.mubr.f32.vlgmr.msra.gmra.mrb[8].mxu1 %v12353_v4 }
 0x1de   : > { %11159 = vmatpush3.bf16.msra.mxu1 %v12211_v28  ;;  %10458 = vmatprep.mubr.f32.mxu1 %v2632_v7 }
 0x1df   : > { %11161 = vmatprep.subr.bf16.mxu1 %v12205_v9 }
 0x1e2   : > { %10561 = vmatmul.mubr.f32.vlgmr.msra.gmra.mrb[8].mxu0 %v3791_v5 }
 0x1e3   : > { %11211 = vmatpush3.bf16.msra.mxu0 %v12205_v9  ;;  %10567 = vmatprep.mubr.f32.mxu0 %v3782_v8 }
 0x1e4   : > { %11213 = vmatprep.subr.bf16.mxu0 %v12218_v29 }
 0x1e5   : > { %10459 = vmatmul.mubr.f32.vlgmr.msra.gmra.mrb[8].mxu1 %v2642_v10 }
 0x1e6   : > { %11163 = vmatpush3.bf16.msra.mxu1 %v12205_v9  ;;  %10465 = vmatprep.mubr.f32.mxu1 %v2633_v12 }
 0x1e7   : > { %11165 = vmatprep.subr.bf16.mxu1 %v12218_v29 }
 0x1ea   : > { %10568 = vmatmul.mubr.f32.vlgmr.msra.gmra.mrb[8].mxu0 %v3792_v11 }
 0x1eb   : > { %11215 = vmatpush3.bf16.msra.mxu0 %v12218_v29  ;;  %10574 = vmatprep.mubr.f32.mxu0 %v12337_v52 }
 0x1ec   : > { %11217 = vmatprep.subr.bf16.mxu0 %v12205_v9 }
 0x1ed   : > { %10466 = vmatmul.mubr.f32.vlgmr.msra.gmra.mrb[8].mxu1 %v2643_v15 }
 0x1ee   : > { %11167 = vmatpush3.bf16.msra.mxu1 %v12218_v29  ;;  %10472 = vmatprep.mubr.f32.mxu1 %v12346_v1 }
 0x1ef   : > { %11169 = vmatprep.subr.bf16.mxu1 %v12205_v9 }
 0x1f2   : > { %10575 = vmatmul.mubr.f32.vlgmr.msra.gmra.mrb[8].mxu0 %v12344_v58 }
 0x1f3   : > { %11219 = vmatpush3.bf16.msra.mxu0 %v12205_v9  ;;  %10581 = vmatprep.mubr.f32.mxu0 %v12337_v52 }
 0x1f5   : > { %10473 = vmatmul.mubr.f32.vlgmr.msra.gmra.mrb[8].mxu1 %v12353_v4 }
 0x1f6   : > { %11171 = vmatpush3.bf16.msra.mxu1 %v12205_v9  ;;  %10479 = vmatprep.mubr.f32.mxu1 %v12346_v1 }
 0x1fa   : > { %10582 = vmatmul.mubr.f32.vlgmr.msra.gmra.mrb[8].mxu0 %v12344_v58 }
 0x1fb   : > { %10588 = vmatprep.mubr.f32.mxu0 %v12256_v50 }
 0x1fd   : > { %10480 = vmatmul.mubr.f32.vlgmr.msra.gmra.mrb[8].mxu1 %v12353_v4 }
 0x1fe   : > { %10486 = vmatprep.mubr.f32.mxu1 %v12256_v50 }
 0x288   : > { %v10334_v33 = vpop.f32.mrb[0].mxu1 }
 0x289   : > { %v1415_v34 = vmul.f32 %v10334_v33, %v12412_v31  ;;  %v1392_v35 = vpop.f32.mrb[1].mxu1  ;;  %v1428_v58 = vmul.f32 0.5, %v10334_v33 }
 0x28a   : > { %v1414_v36 = vmul.f32 %v1392_v35, %v12412_v31  ;;  %v1427_v2 = vmul.f32 0.5, %v1392_v35 }
 0x28b   : > { %v1419_v37 = vadd.f32 %v1415_v34, %v12415_v32 }
 0x28c   : > { %v1418_v38 = vadd.f32 %v1414_v36, %v12415_v32  ;;  %v10337_v39 = vpop.f32.mrb[2].mxu1 }
 0x28d   : > { %1424 = vst.msk [vmem:[%s12421_s23 + $0x8] sm:$0xff] %vm1422_vm2, %v1419_v37  ;;  %v1417_v40 = vmul.f32 %v10337_v39, %v12412_v31  ;;  %v1404_v41 = vpop.f32.mrb[3].mxu1  ;;  %v1430_v12 = vmul.f32 0.5, %v10337_v39 }
 0x28e   : > { %1423 = vst.msk [vmem:[%s12421_s23] sm:$0xff] %vm1422_vm2, %v1418_v38  ;;  %v1416_v42 = vmul.f32 %v1404_v41, %v12412_v31  ;;  %v1429_v16 = vmul.f32 0.5, %v1404_v41 }
 0x28f   : > { %1426 = vst.msk [vmem:[%s12421_s23 + $0x18] sm:$0xff] %vm1422_vm2, %v1417_v40 }
 0x290   : > { %v1420_v43 = vadd.f32 %v1416_v42, %v12415_v32 }
 0x292   : > { %1425 = vst.msk [vmem:[%s12421_s23 + $0x10] sm:$0xff] %vm1422_vm2, %v1420_v43 }
 0x29d   : > { %v10436_v44 = vpop.f32.mrb[4].mxu0 }
 0x29e   : > { %v2508_v45 = vpop.f32.mrb[5].mxu0 }
 0x2a0   : > { %v10406_v49 = vpop.f32.mrb[4].mxu1 }
 0x2a1   : > { %v12434_v51 = vadd.f32 %v10436_v44, %v10406_v49  ;;  %v10439_v52 = vpop.f32.mrb[6].mxu0  ;;  %v2220_v53 = vpop.f32.mrb[5].mxu1 }
 0x2a2   : > { %v12436_v54 = vadd.f32 %v2508_v45, %v2220_v53  ;;  %v2520_v55 = vpop.f32.mrb[7].mxu0 }
 0x2a3   : > { %v2531_v1 = vmul.f32 0.5, %v12434_v51 }
 0x2a4   : > { %v2530_v3 = vmul.f32 0.5, %v12436_v54  ;;  %v10409_v4 = vpop.f32.mrb[6].mxu1 }
 0x2a5   : > { %v2535_v5 = vadd.f32 %v2531_v1, %v1428_v58  ;;  %v12440_v7 = vadd.f32 %v10439_v52, %v10409_v4  ;;  %v2234_v8 = vpop.f32.mrb[7].mxu1 }
 0x2a6   : > { %v2534_v10 = vadd.f32 %v2530_v3, %v1427_v2  ;;  %v12442_v11 = vadd.f32 %v2520_v55, %v2234_v8 }
 0x2a7   : > { %v2539_v13 = vmul.f32 %v2535_v5, %v12412_v31  ;;  %v2533_v15 = vmul.f32 0.5, %v12440_v7 }
 0x2a8   : > { %v2538_v17 = vmul.f32 %v2534_v10, %v12412_v31  ;;  %v2532_v19 = vmul.f32 0.5, %v12442_v11 }
 0x2a9   : > { %v2543_v20 = vadd.f32 %v2539_v13, %v12415_v32  ;;  %v2537_v21 = vadd.f32 %v2533_v15, %v1430_v12 }
 0x2aa   : > { %v2542_v23 = vadd.f32 %v2538_v17, %v12415_v32  ;;  %v2536_v24 = vadd.f32 %v2532_v19, %v1429_v16 }
 0x2ab   : > { %9613 = vst.msk [vmem:[%s12421_s23 + $0x28] sm:$0xff] %vm1422_vm2, %v2543_v20  ;;  %v2541_v25 = vmul.f32 %v2537_v21, %v12412_v31  ;;  %v9642_v21 = vld [vmem:[%s12191_s20 + $0x50] sm:$0xff] }
 0x2ac   : > { %9612 = vst.msk [vmem:[%s12421_s23 + $0x20] sm:$0xff] %vm1422_vm2, %v2542_v23  ;;  %v2540_v26 = vmul.f32 %v2536_v24, %v12412_v31  ;;  %v5981_v23 = vsel %vm305_vm0, %v9642_v21, 0  ;;  %v9643_v24 = vld [vmem:[%s12191_s20 + $0x58] sm:$0xff] }
 0x2ad   : > { %9615 = vst.msk [vmem:[%s12421_s23 + $0x38] sm:$0xff] %vm1422_vm2, %v2541_v25  ;;  %v9632_v25 = vld [vmem:[%s12191_s20 + $0x40] sm:$0xff] }
 0x2ae   : > { %v2544_v30 = vadd.f32 %v2540_v26, %v12415_v32  ;;  %v12503_v26 = vand.u32 4294901760, %v5981_v23 }
 0x2b0   : > { %9614 = vst.msk [vmem:[%s12421_s23 + $0x30] sm:$0xff] %vm1422_vm2, %v2544_v30  ;;  %v5984_v30 = vsel %vm305_vm0, %v9643_v24, 0 }
 0x2cd   : > { %v10583_v33 = vpop.f32.mrb[8].mxu0 }
 0x2ce   : > { %v4219_v34 = vand.u32 4294901760, %v10583_v33  ;;  %v4205_v35 = vpop.f32.mrb[9].mxu0 }
 0x2cf   : > { %v4216_v36 = vand.u32 4294901760, %v4205_v35 }
 0x2d0   : > { %v4331_v37 = vsub.f32 %v10583_v33, %v4219_v34  ;;  %v10481_v38 = vpop.f32.mrb[8].mxu1  ;;  %v4832_v33 = vsel %vm305_vm0, %v9632_v25, 0 }
 0x2d1   : > { %v12461_v39 = vpack.c.bf16 %v4219_v34, %v4216_v36  ;;  %v4324_v40 = vsub.f32 %v4205_v35, %v4216_v36  ;;  %v3070_v41 = vand.u32 4294901760, %v10481_v38  ;;  %v3056_v42 = vpop.f32.mrb[9].mxu1  ;;  %v9633_v34 = vld [vmem:[%s12191_s20 + $0x48] sm:$0xff]  ;;  %v12511_v35 = vand.u32 4294901760, %v5984_v30 }
 0x2d2   : > { %v4332_v43 = vand.u32 4294901760, %v4331_v37  ;;  %v3067_v44 = vand.u32 4294901760, %v3056_v42  ;;  %v12513_v36 = vand.u32 4294901760, %v4832_v33 }
 0x2d3   : > { %v4325_v45 = vand.u32 4294901760, %v4324_v40  ;;  %v3182_v49 = vsub.f32 %v10481_v38, %v3070_v41  ;;  %11221 = vmatprep.subr.bf16.mxu0 %v12461_v39  ;;  %v11228_v52 = vpack.c.bf16 %v4331_v37, %v4324_v40  ;;  %v6054_v38 = vsub.f32 %v5981_v23, %v12503_v26 }
 0x2d4   : > { %v4333_v53 = vsub.f32 %v4331_v37, %v4332_v43  ;;  %v12464_v55 = vpack.c.bf16 %v3070_v41, %v3067_v44  ;;  %v3175_v58 = vsub.f32 %v3056_v42, %v3067_v44  ;;  %11223 = vmatpush3.bf16.msra.mxu0 %v12461_v39  ;;  %v4835_v37 = vsel %vm305_vm0, %v9633_v34, 0 }
 0x2d5   : > { %v4326_v1 = vsub.f32 %v4324_v40, %v4325_v45  ;;  %v3183_v2 = vand.u32 4294901760, %v3182_v49  ;;  %v11236_v3 = vpack.c.bf16 %v4332_v43, %v4325_v45  ;;  %v12521_v40 = vand.u32 4294901760, %v4835_v37 }
 0x2d6   : > { %v3176_v4 = vand.u32 4294901760, %v3175_v58  ;;  %11173 = vmatprep.subr.bf16.mxu1 %v12464_v55  ;;  %v4334_v5 = vand.u32 4294901760, %v4333_v53  ;;  %v11180_v8 = vpack.c.bf16 %v3182_v49, %v3175_v58  ;;  %v6064_v41 = vsub.f32 %v5984_v30, %v12511_v35 }
 0x2d7   : > { %v3184_v10 = vsub.f32 %v3182_v49, %v3183_v2  ;;  %10589 = vmatmul.mubr.f32.vlgmr.msra.gmra.mrb[10].mxu0 %v12299_v14  ;;  %11175 = vmatpush3.bf16.msra.mxu1 %v12464_v55  ;;  %v4327_v12 = vand.u32 4294901760, %v4326_v1  ;;  %v4905_v42 = vsub.f32 %v4832_v33, %v12513_v36  ;;  %v6055_v43 = vand.u32 4294901760, %v6054_v38 }
 0x2d8   : > { %v3177_v13 = vsub.f32 %v3175_v58, %v3176_v4  ;;  %10591 = vmatprep.mubr.f32.mxu0 %v12303_v18  ;;  %v11188_v15 = vpack.c.bf16 %v3183_v2, %v3176_v4  ;;  %v4915_v44 = vsub.f32 %v4835_v37, %v12521_v40  ;;  %v6065_v45 = vand.u32 4294901760, %v6064_v41 }
 0x2d9   : > { %v11224_v16 = vpack.c.bf16 %v4334_v5, %v4327_v12  ;;  %v3185_v17 = vand.u32 4294901760, %v3184_v10  ;;  %v4906_v49 = vand.u32 4294901760, %v4905_v42  ;;  %v3676_v12 = vmul.f32 0.16666667, %v12434_v51 }
 0x2da   : > { %10487 = vmatmul.mubr.f32.vlgmr.msra.gmra.mrb[10].mxu1 %v12299_v14  ;;  %v3178_v19 = vand.u32 4294901760, %v3177_v13  ;;  %v6066_v53 = vsub.f32 %v6064_v41, %v6065_v45  ;;  %v2551_v13 = vmul.f32 0.8333333, %v12436_v54 }
 0x2db   : > { %10592 = vmatmul.mubr.f32.gmra.mrb[12].mxu0 %v12306_v22  ;;  %11225 = vmatprep.subr.bf16.mxu0 %v11224_v16 }
 0x2dc   : > { %11227 = vmatpush3.bf16.msra.mxu0 %v11224_v16  ;;  %10489 = vmatprep.mubr.f32.mxu1 %v12303_v18  ;;  %v11176_v20 = vpack.c.bf16 %v3185_v17, %v3178_v19  ;;  %v6067_v2 = vand.u32 4294901760, %v6066_v53  ;;  %v2554_v16 = vmul.f32 0.8333333, %v12440_v7  ;;  %v3678_v17 = vmul.f32 0.16666667, %v12440_v7 }
 0x2dd   : > { %11229 = vmatprep.subr.bf16.mxu0 %v11228_v52  ;;  %10598 = vmatprep.mubr.f32.mxu0 %v12245_v46 }
 0x2de   : > { %10490 = vmatmul.mubr.f32.gmra.mrb[12].mxu1 %v12306_v22  ;;  %11177 = vmatprep.subr.bf16.mxu1 %v11176_v20 }
 0x2df   : > { %10599 = vmatmul.mubr.f32.vlgmr.msra.gmra.mrb[10].mxu0 %v12270_v56  ;;  %11179 = vmatpush3.bf16.msra.mxu1 %v11176_v20 }
 0x2e0   : > { %11231 = vmatpush3.bf16.msra.mxu0 %v11228_v52  ;;  %11181 = vmatprep.subr.bf16.mxu1 %v11180_v8  ;;  %v4916_v52 = vand.u32 4294901760, %v4915_v44 }
 0x2e1   : > { %11233 = vmatprep.subr.bf16.mxu0 %v12461_v39  ;;  %10496 = vmatprep.mubr.f32.mxu1 %v12245_v46 }
 0x2e2   : > { %10601 = vmatprep.mubr.f32.mxu0 %v12272_v57  ;;  %10497 = vmatmul.mubr.f32.vlgmr.msra.gmra.mrb[10].mxu1 %v12270_v56  ;;  %v4917_v1 = vsub.f32 %v4915_v44, %v4916_v52 }
 0x2e3   : > { %10602 = vmatmul.mubr.f32.gmra.mrb[12].mxu0 %v12278_v60  ;;  %11183 = vmatpush3.bf16.msra.mxu1 %v11180_v8  ;;  %v2552_v8 = vmul.f32 0.8333333, %v12434_v51  ;;  %v3677_v51 = vmul.f32 0.16666667, %v12442_v11 }
 0x2e4   : > { %11185 = vmatprep.subr.bf16.mxu1 %v12464_v55  ;;  %10499 = vmatprep.mubr.f32.mxu1 %v12272_v57  ;;  %v4918_v4 = vand.u32 4294901760, %v4917_v1 }
 0x2e5   : > { %10608 = vmatprep.mubr.f32.mxu0 %v12248_v47 }
 0x2e6   : > { %10500 = vmatmul.mubr.f32.gmra.mrb[12].mxu1 %v12278_v60 }
 0x2e7   : > { %10609 = vmatmul.mubr.f32.vlgmr.msra.gmra.mrb[10].mxu0 %v12276_v59  ;;  %10506 = vmatprep.mubr.f32.mxu1 %v12248_v47 }
 0x2e8   : > { %11235 = vmatpush3.bf16.msra.mxu0 %v12461_v39  ;;  %10611 = vmatprep.mubr.f32.mxu0 %v12281_v61 }
 0x2e9   : > { %11237 = vmatprep.subr.bf16.mxu0 %v11236_v3 }
 0x2ea   : > { %10507 = vmatmul.mubr.f32.vlgmr.msra.gmra.mrb[10].mxu1 %v12276_v59 }
 0x2eb   : > { %11187 = vmatpush3.bf16.msra.mxu1 %v12464_v55  ;;  %10612 = vmatmul.mubr.f32.gmra.mrb[12].mxu0 %v12287_v63 }
 0x2ec   : > { %11189 = vmatprep.subr.bf16.mxu1 %v11188_v15  ;;  %10509 = vmatprep.mubr.f32.mxu1 %v12281_v61 }
 0x2ed   : > { %10618 = vmatprep.mubr.f32.mxu0 %v12251_v48 }
 0x2ee   : > { %10510 = vmatmul.mubr.f32.gmra.mrb[12].mxu1 %v12287_v63 }
 0x2ef   : > { %10619 = vmatmul.mubr.f32.vlgmr.msra.gmra.mrb[10].mxu0 %v12284_v62  ;;  %10516 = vmatprep.mubr.f32.mxu1 %v12251_v48 }
 0x2f0   : > { %11239 = vmatpush3.bf16.msra.mxu0 %v11236_v3  ;;  %10621 = vmatprep.mubr.f32.mxu0 %v12290_v0 }
 0x2f1   : > { %11241 = vmatprep.subr.bf16.mxu0 %v12461_v39 }
 0x2f2   : > { %10517 = vmatmul.mubr.f32.vlgmr.msra.gmra.mrb[10].mxu1 %v12284_v62 }
 0x2f3   : > { %11191 = vmatpush3.bf16.msra.mxu1 %v11188_v15  ;;  %10622 = vmatmul.mubr.f32.gmra.mrb[12].mxu0 %v12295_v6  ;;  %v3675_v15 = vmul.f32 0.16666667, %v12436_v54 }
 0x2f4   : > { %11193 = vmatprep.subr.bf16.mxu1 %v12464_v55  ;;  %10519 = vmatprep.mubr.f32.mxu1 %v12290_v0 }
 0x2f5   : > { %10628 = vmatprep.mubr.f32.mxu0 %v12245_v46 }
 0x2f6   : > { %10520 = vmatmul.mubr.f32.gmra.mrb[12].mxu1 %v12295_v6 }
 0x2f7   : > { %10629 = vmatmul.mubr.f32.vlgmr.msra.gmra.mrb[10].mxu0 %v12270_v56  ;;  %10526 = vmatprep.mubr.f32.mxu1 %v12245_v46 }
 0x2f8   : > { %11243 = vmatpush3.bf16.msra.mxu0 %v12461_v39  ;;  %10631 = vmatprep.mubr.f32.mxu0 %v12272_v57  ;;  %v6056_v39 = vsub.f32 %v6054_v38, %v6055_v43 }
 0x2f9   : > { %11293 = vmatprep.subr.bf16.mxu0 %v12205_v9 }
 0x2fa   : > { %10527 = vmatmul.mubr.f32.vlgmr.msra.gmra.mrb[10].mxu1 %v12270_v56  ;;  %v6057_v58 = vand.u32 4294901760, %v6056_v39 }
 0x2fb   : > { %11195 = vmatpush3.bf16.msra.mxu1 %v12464_v55  ;;  %10632 = vmatmul.mubr.f32.gmra.mrb[12].mxu0 %v12278_v60  ;;  %v4907_v55 = vsub.f32 %v4905_v42, %v4906_v49 }
 0x2fc   : > { %10529 = vmatprep.mubr.f32.mxu1 %v12272_v57  ;;  %10638 = vmatprep.mubr.f32.mxu0 %v12245_v46 }
 0x2fd   : > { %11245 = vmatprep.subr.bf16.mxu1 %v12205_v9  ;;  %v4908_v3 = vand.u32 4294901760, %v4907_v55 }
 0x2fe   : > { %10530 = vmatmul.mubr.f32.gmra.mrb[12].mxu1 %v12278_v60 }
 0x2ff   : > { %10639 = vmatmul.mubr.f32.vlgmr.msra.gmra.mrb[10].mxu0 %v12270_v56  ;;  %10536 = vmatprep.mubr.f32.mxu1 %v12245_v46 }
 0x300   : > { %10641 = vmatprep.mubr.f32.mxu0 %v12272_v57  ;;  %11295 = vmatpush3.bf16.msra.mxu0 %v12205_v9 }
 0x301   : > { %11297 = vmatprep.subr.bf16.mxu0 %v12209_v27 }
 0x302   : > { %10537 = vmatmul.mubr.f32.vlgmr.msra.gmra.mrb[10].mxu1 %v12270_v56 }
 0x303   : > { %10642 = vmatmul.mubr.f32.gmra.mrb[12].mxu0 %v12278_v60  ;;  %10539 = vmatprep.mubr.f32.mxu1 %v12272_v57 }
 0x304   : > { %10750 = vmatprep.mubr.f32.mxu0 %v6057_v58  ;;  %11247 = vmatpush3.bf16.msra.mxu1 %v12205_v9 }
 0x305   : > { %11249 = vmatprep.subr.bf16.mxu1 %v12209_v27 }
 0x306   : > { %10540 = vmatmul.mubr.f32.gmra.mrb[12].mxu1 %v12278_v60 }
 0x307   : > { %10751 = vmatmul.mubr.f32.vlgmr.msra.gmra.mrb[14].mxu0 %v6067_v2  ;;  %10648 = vmatprep.mubr.f32.mxu1 %v4908_v3 }
 0x308   : > { %11299 = vmatpush3.bf16.msra.mxu0 %v12209_v27  ;;  %10757 = vmatprep.mubr.f32.mxu0 %v12503_v26 }
 0x309   : > { %11301 = vmatprep.subr.bf16.mxu0 %v12211_v28 }
 0x30a   : > { %10649 = vmatmul.mubr.f32.vlgmr.msra.gmra.mrb[14].mxu1 %v4918_v4 }
 0x30b   : > { %11251 = vmatpush3.bf16.msra.mxu1 %v12209_v27  ;;  %10655 = vmatprep.mubr.f32.mxu1 %v12513_v36 }
 0x30c   : > { %11253 = vmatprep.subr.bf16.mxu1 %v12211_v28 }
 0x30f   : > { %10758 = vmatmul.mubr.f32.vlgmr.msra.gmra.mrb[14].mxu0 %v12511_v35 }
 0x310   : > { %11303 = vmatpush3.bf16.msra.mxu0 %v12211_v28  ;;  %10764 = vmatprep.mubr.f32.mxu0 %v6054_v38 }
 0x311   : > { %11305 = vmatprep.subr.bf16.mxu0 %v12205_v9 }
 0x312   : > { %10656 = vmatmul.mubr.f32.vlgmr.msra.gmra.mrb[14].mxu1 %v12521_v40 }
 0x313   : > { %11255 = vmatpush3.bf16.msra.mxu1 %v12211_v28  ;;  %10662 = vmatprep.mubr.f32.mxu1 %v4905_v42 }
 0x314   : > { %11257 = vmatprep.subr.bf16.mxu1 %v12205_v9 }
 0x317   : > { %10765 = vmatmul.mubr.f32.vlgmr.msra.gmra.mrb[14].mxu0 %v6064_v41 }
 0x318   : > { %11307 = vmatpush3.bf16.msra.mxu0 %v12205_v9  ;;  %10771 = vmatprep.mubr.f32.mxu0 %v6055_v43 }
 0x319   : > { %11309 = vmatprep.subr.bf16.mxu0 %v12218_v29 }
 0x31a   : > { %10663 = vmatmul.mubr.f32.vlgmr.msra.gmra.mrb[14].mxu1 %v4915_v44 }
 0x31b   : > { %11259 = vmatpush3.bf16.msra.mxu1 %v12205_v9  ;;  %10669 = vmatprep.mubr.f32.mxu1 %v4906_v49 }
 0x31c   : > { %11261 = vmatprep.subr.bf16.mxu1 %v12218_v29 }
 0x31f   : > { %10772 = vmatmul.mubr.f32.vlgmr.msra.gmra.mrb[14].mxu0 %v6065_v45 }
 0x320   : > { %11311 = vmatpush3.bf16.msra.mxu0 %v12218_v29  ;;  %10778 = vmatprep.mubr.f32.mxu0 %v12503_v26 }
 0x321   : > { %11313 = vmatprep.subr.bf16.mxu0 %v12205_v9 }
 0x322   : > { %10670 = vmatmul.mubr.f32.vlgmr.msra.gmra.mrb[14].mxu1 %v4916_v52 }
 0x323   : > { %11263 = vmatpush3.bf16.msra.mxu1 %v12218_v29  ;;  %10676 = vmatprep.mubr.f32.mxu1 %v12513_v36 }
 0x324   : > { %11265 = vmatprep.subr.bf16.mxu1 %v12205_v9 }
 0x327   : > { %10779 = vmatmul.mubr.f32.vlgmr.msra.gmra.mrb[14].mxu0 %v12511_v35 }
 0x328   : > { %11315 = vmatpush3.bf16.msra.mxu0 %v12205_v9  ;;  %10785 = vmatprep.mubr.f32.mxu0 %v12503_v26  ;;  %v2553_v26 = vmul.f32 0.8333333, %v12442_v11 }
 0x32a   : > { %10677 = vmatmul.mubr.f32.vlgmr.msra.gmra.mrb[14].mxu1 %v12521_v40 }
 0x32b   : > { %11267 = vmatpush3.bf16.msra.mxu1 %v12205_v9  ;;  %10683 = vmatprep.mubr.f32.mxu1 %v12513_v36 }
 0x32f   : > { %10786 = vmatmul.mubr.f32.vlgmr.msra.gmra.mrb[14].mxu0 %v12511_v35 }
 0x330   : > { %10792 = vmatprep.mubr.f32.mxu0 %v12256_v50 }
 0x332   : > { %10684 = vmatmul.mubr.f32.vlgmr.msra.gmra.mrb[14].mxu1 %v12521_v40 }
 0x333   : > { %10690 = vmatprep.mubr.f32.mxu1 %v12256_v50 }
 0x3d2   : > { %v12581_v5 = vpop.f32.mrb[10].mxu0 }
 0x3d3   : > { %v12584_v10 = vpop.f32.mrb[11].mxu0  ;;  %v4804_v19 = vmul.f32 0.5, %v12581_v5 }
 0x3d4   : > { %v4803_v7 = vmul.f32 0.5, %v12584_v10 }
 0x3d5   : > { %v10538_v20 = vpop.f32.mrb[10].mxu1 }
 0x3d6   : > { %v3655_v21 = vmul.f32 0.16666667, %v10538_v20  ;;  %v3680_v23 = vmul.f32 0.8333333, %v10538_v20  ;;  %v3701_v24 = vmul.f32 0.5, %v10538_v20  ;;  %v12592_v25 = vpop.f32.mrb[12].mxu0 }
 0x3d7   : > { %v3632_v30 = vpop.f32.mrb[11].mxu1  ;;  %v12596_v36 = vpop.f32.mrb[13].mxu0  ;;  %v4806_v37 = vmul.f32 0.5, %v12592_v25 }
 0x3d8   : > { %v3659_v33 = vadd.f32 %v3655_v21, %v2552_v8  ;;  %v3684_v34 = vadd.f32 %v3680_v23, %v3676_v12  ;;  %v4808_v54 = vadd.f32 %v4804_v19, %v3701_v24  ;;  %v3654_v35 = vmul.f32 0.16666667, %v3632_v30 }
 0x3d9   : > { %v3679_v38 = vmul.f32 0.8333333, %v3632_v30  ;;  %v3700_v40 = vmul.f32 0.5, %v3632_v30  ;;  %v10541_v44 = vpop.f32.mrb[12].mxu1  ;;  %v4805_v39 = vmul.f32 0.5, %v12596_v36 }
 0x3da   : > { %v3663_v41 = vmul.f32 %v3659_v33, %v12412_v31  ;;  %v3688_v42 = vmul.f32 %v3684_v34, %v12412_v31  ;;  %v4812_v43 = vmul.f32 %v4808_v54, %v12412_v31  ;;  %v3658_v11 = vadd.f32 %v3654_v35, %v2551_v13  ;;  %v3644_v53 = vpop.f32.mrb[13].mxu1 }
 0x3db   : > { %v3683_v45 = vadd.f32 %v3679_v38, %v3675_v15  ;;  %v4807_v49 = vadd.f32 %v4803_v7, %v3700_v40  ;;  %v3657_v52 = vmul.f32 0.16666667, %v10541_v44  ;;  %v3682_v12 = vmul.f32 0.8333333, %v10541_v44 }
 0x3dc   : > { %v3667_v55 = vadd.f32 %v3663_v41, %v12415_v32  ;;  %v3692_v58 = vadd.f32 %v3688_v42, %v12415_v32  ;;  %v4816_v1 = vadd.f32 %v4812_v43, %v12415_v32  ;;  %v3662_v2 = vmul.f32 %v3658_v11, %v12412_v31 }
 0x3dd   : > { %v3687_v3 = vmul.f32 %v3683_v45, %v12412_v31  ;;  %v4811_v4 = vmul.f32 %v4807_v49, %v12412_v31  ;;  %v3661_v8 = vadd.f32 %v3657_v52, %v2554_v16  ;;  %v3703_v15 = vmul.f32 0.5, %v10541_v44 }
 0x3de   : > { %9619 = vst.msk [vmem:[%s12421_s23 + $0x48] sm:$0xff] %vm1422_vm2, %v3667_v55  ;;  %9623 = vst.msk [vmem:[%s12421_s23 + $0x68] sm:$0xff] %vm1422_vm2, %v3692_v58  ;;  %v3666_v13 = vadd.f32 %v3662_v2, %v12415_v32  ;;  %v3656_v19 = vmul.f32 0.16666667, %v3644_v53  ;;  %v3681_v20 = vmul.f32 0.8333333, %v3644_v53  ;;  %v3686_v24 = vadd.f32 %v3682_v12, %v3678_v17 }
 0x3df   : > { %9629 = vst.msk [vmem:[%s12421_s23 + $0x88] sm:$0xff] %vm1422_vm2, %v4816_v1  ;;  %v3691_v21 = vadd.f32 %v3687_v3, %v12415_v32  ;;  %v4815_v23 = vadd.f32 %v4811_v4, %v12415_v32  ;;  %v3665_v16 = vmul.f32 %v3661_v8, %v12412_v31  ;;  %v4810_v30 = vadd.f32 %v4806_v37, %v3703_v15 }
 0x3e0   : > { %9618 = vst.msk [vmem:[%s12421_s23 + $0x40] sm:$0xff] %vm1422_vm2, %v3666_v13  ;;  %v3660_v33 = vadd.f32 %v3656_v19, %v2553_v26  ;;  %v3685_v34 = vadd.f32 %v3681_v20, %v3677_v51  ;;  %v3702_v54 = vmul.f32 0.5, %v3644_v53  ;;  %v3690_v35 = vmul.f32 %v3686_v24, %v12412_v31 }
 0x3e1   : > { %9622 = vst.msk [vmem:[%s12421_s23 + $0x60] sm:$0xff] %vm1422_vm2, %v3691_v21  ;;  %9628 = vst.msk [vmem:[%s12421_s23 + $0x80] sm:$0xff] %vm1422_vm2, %v4815_v23  ;;  %v4814_v7 = vmul.f32 %v4810_v30, %v12412_v31 }
 0x3e2   : > { %9621 = vst.msk [vmem:[%s12421_s23 + $0x58] sm:$0xff] %vm1422_vm2, %v3665_v16  ;;  %v3664_v17 = vmul.f32 %v3660_v33, %v12412_v31  ;;  %v3689_v37 = vmul.f32 %v3685_v34, %v12412_v31  ;;  %v4809_v26 = vadd.f32 %v4805_v39, %v3702_v54  ;;  %9625 = vst.msk [vmem:[%s12421_s23 + $0x78] sm:$0xff] %vm1422_vm2, %v3690_v35 }
 0x3e3   : > { %9631 = vst.msk [vmem:[%s12421_s23 + $0x98] sm:$0xff] %vm1422_vm2, %v4814_v7 }
 0x3e4   : > { %v3668_v51 = vadd.f32 %v3664_v17, %v12415_v32  ;;  %v3693_v38 = vadd.f32 %v3689_v37, %v12415_v32  ;;  %v4813_v40 = vmul.f32 %v4809_v26, %v12412_v31  ;;  %v9658_v37 = vld [vmem:[%s12191_s20 + $0x70] sm:$0xff] }
 0x3e5   : > { %v8254_v26 = vsel %vm305_vm0, %v9658_v37, 0 }
 0x3e6   : > { %9620 = vst.msk [vmem:[%s12421_s23 + $0x50] sm:$0xff] %vm1422_vm2, %v3668_v51  ;;  %9624 = vst.msk [vmem:[%s12421_s23 + $0x70] sm:$0xff] %vm1422_vm2, %v3693_v38  ;;  %v4817_v41 = vadd.f32 %v4813_v40, %v12415_v32  ;;  %v9659_v51 = vld [vmem:[%s12191_s20 + $0x78] sm:$0xff]  ;;  %v9648_v38 = vld [vmem:[%s12191_s20 + $0x60] sm:$0xff]  ;;  %v12688_v40 = vand.u32 4294901760, %v8254_v26 }
 0x3e8   : > { %9630 = vst.msk [vmem:[%s12421_s23 + $0x90] sm:$0xff] %vm1422_vm2, %v4817_v41  ;;  %v8257_v41 = vsel %vm305_vm0, %v9659_v51, 0 }
 0x402   : > { %v10787_v42 = vpop.f32.mrb[14].mxu0 }
 0x403   : > { %v6492_v43 = vand.u32 4294901760, %v10787_v42  ;;  %v6478_v11 = vpop.f32.mrb[15].mxu0 }
 0x404   : > { %v6489_v44 = vand.u32 4294901760, %v6478_v11 }
 0x405   : > { %v6604_v45 = vsub.f32 %v10787_v42, %v6492_v43  ;;  %v10685_v49 = vpop.f32.mrb[14].mxu1  ;;  %v7105_v42 = vsel %vm305_vm0, %v9648_v38, 0 }
 0x406   : > { %v12646_v39 = vpack.c.bf16 %v6492_v43, %v6489_v44  ;;  %v6597_v52 = vsub.f32 %v6478_v11, %v6489_v44  ;;  %v5343_v53 = vand.u32 4294901760, %v10685_v49  ;;  %v5329_v55 = vpop.f32.mrb[15].mxu1  ;;  %v9649_v43 = vld [vmem:[%s12191_s20 + $0x68] sm:$0xff]  ;;  %v12696_v11 = vand.u32 4294901760, %v8257_v41  ;;  %s9480_s20 = sshll.u32 %s12421_s23, 4  ;;  %s13202_s20 = int_to_ptr.vmem [resolvable:$true] %s9480_s20 }
 0x407   : > { %v6605_v58 = vand.u32 4294901760, %v6604_v45  ;;  %v5340_v1 = vand.u32 4294901760, %v5329_v55  ;;  %v12698_v44 = vand.u32 4294901760, %v7105_v42  ;;  %s11853_s14 = scalar_lea.vmem %s13202_s20, 16384  ;;  %p11860_p3 = scmp.lt.s32.totalorder %s13202_s20, %s11858_s5 }
 0x408   : > { %v6598_v2 = vand.u32 4294901760, %v6597_v52  ;;  %v5455_v3 = vsub.f32 %v10685_v49, %v5343_v53  ;;  %11317 = vmatprep.subr.bf16.mxu0 %v12646_v39  ;;  %v11324_v4 = vpack.c.bf16 %v6604_v45, %v6597_v52  ;;  %v8327_v49 = vsub.f32 %v8254_v26, %v12688_v40  ;;  %p11854_p7 = scmp.ne.s32.totalorder %s13202_s20, %s11853_s14  ;;  %p11861_p12 = scmp.lt.s32.totalorder %s11859_s2, %s11853_s14 }
 0x409   : > { %v6606_v8 = vsub.f32 %v6604_v45, %v6605_v58  ;;  %v12649_v12 = vpack.c.bf16 %v5343_v53, %v5340_v1  ;;  %v5448_v13 = vsub.f32 %v5329_v55, %v5340_v1  ;;  %11319 = vmatpush3.bf16.msra.mxu0 %v12646_v39  ;;  %v7108_v45 = vsel %vm305_vm0, %v9649_v43, 0 }
 0x40a   : > { %v6599_v15 = vsub.f32 %v6597_v52, %v6598_v2  ;;  %v5456_v19 = vand.u32 4294901760, %v5455_v3  ;;  %v11332_v20 = vpack.c.bf16 %v6605_v58, %v6598_v2  ;;  %v12706_v52 = vand.u32 4294901760, %v7108_v45  ;;  %p11855_p11 = pnand %p11854_p7, %p13299_p9  ;;  %p11862_p2 = por %p11861_p12, %p11860_p3 }
 0x40b   : > { %v5449_v21 = vand.u32 4294901760, %v5448_v13  ;;  %11269 = vmatprep.subr.bf16.mxu1 %v12649_v12  ;;  %v6607_v23 = vand.u32 4294901760, %v6606_v8  ;;  %v11276_v16 = vpack.c.bf16 %v5455_v3, %v5448_v13  ;;  %v8337_v53 = vsub.f32 %v8257_v41, %v12696_v11 }
 0x40c   : > { %v5457_v24 = vsub.f32 %v5455_v3, %v5456_v19  ;;  %10793 = vmatmul.mubr.f32.vlgmr.msra.gmra.mrb[16].mxu0 %v12299_v14  ;;  %11271 = vmatpush3.bf16.msra.mxu1 %v12649_v12  ;;  %v6600_v30 = vand.u32 4294901760, %v6599_v15  ;;  %v7178_v55 = vsub.f32 %v7105_v42, %v12698_v44  ;;  %v8328_v58 = vand.u32 4294901760, %v8327_v49  ;;  %p11856_p13 = pneg %p11855_p11 }
 0x40d   : > { %v5450_v33 = vsub.f32 %v5448_v13, %v5449_v21  ;;  %10795 = vmatprep.mubr.f32.mxu0 %v12303_v18  ;;  %v11284_v34 = vpack.c.bf16 %v5456_v19, %v5449_v21  ;;  %v7188_v1 = vsub.f32 %v7108_v45, %v12706_v52  ;;  %v8338_v2 = vand.u32 4294901760, %v8337_v53 }
 0x40e   : > { %v11320_v54 = vpack.c.bf16 %v6607_v23, %v6600_v30  ;;  %v5458_v35 = vand.u32 4294901760, %v5457_v24  ;;  %v7179_v3 = vand.u32 4294901760, %v7178_v55  ;;  %v5949_v23 = vmul.f32 0.16666667, %v12581_v5  ;;  %p11863_p0 = pnand %p11862_p2, %p11856_p13 }
 0x40f   : > { %10691 = vmatmul.mubr.f32.vlgmr.msra.gmra.mrb[16].mxu1 %v12299_v14  ;;  %v5451_v7 = vand.u32 4294901760, %v5450_v33  ;;  %v8339_v8 = vsub.f32 %v8337_v53, %v8338_v2  ;;  %v4827_v24 = vmul.f32 0.8333333, %v12592_v25  ;;  %v5951_v30 = vmul.f32 0.16666667, %v12592_v25 }
 0x410   : > { %10796 = vmatmul.mubr.f32.gmra.mrb[18].mxu0 %v12306_v22  ;;  %11321 = vmatprep.subr.bf16.mxu0 %v11320_v54 }
 0x411   : > { %11323 = vmatpush3.bf16.msra.mxu0 %v11320_v54  ;;  %10693 = vmatprep.mubr.f32.mxu1 %v12303_v18  ;;  %v11272_v17 = vpack.c.bf16 %v5458_v35, %v5451_v7  ;;  %v8340_v19 = vand.u32 4294901760, %v8339_v8 }
 0x412   : > { %11325 = vmatprep.subr.bf16.mxu0 %v11324_v4  ;;  %10802 = vmatprep.mubr.f32.mxu0 %v12245_v46 }
 0x413   : > { %10694 = vmatmul.mubr.f32.gmra.mrb[18].mxu1 %v12306_v22  ;;  %11273 = vmatprep.subr.bf16.mxu1 %v11272_v17 }
 0x414   : > { %10803 = vmatmul.mubr.f32.vlgmr.msra.gmra.mrb[16].mxu0 %v12270_v56  ;;  %11275 = vmatpush3.bf16.msra.mxu1 %v11272_v17  ;;  %v4826_v17 = vmul.f32 0.8333333, %v12596_v36 }
 0x415   : > { %11327 = vmatpush3.bf16.msra.mxu0 %v11324_v4  ;;  %11277 = vmatprep.subr.bf16.mxu1 %v11276_v16  ;;  %v7189_v4 = vand.u32 4294901760, %v7188_v1 }
 0x416   : > { %11329 = vmatprep.subr.bf16.mxu0 %v12646_v39  ;;  %10700 = vmatprep.mubr.f32.mxu1 %v12245_v46 }
 0x417   : > { %10805 = vmatprep.mubr.f32.mxu0 %v12272_v57  ;;  %10701 = vmatmul.mubr.f32.vlgmr.msra.gmra.mrb[16].mxu1 %v12270_v56  ;;  %v7190_v15 = vsub.f32 %v7188_v1, %v7189_v4 }
 0x418   : > { %10806 = vmatmul.mubr.f32.gmra.mrb[18].mxu0 %v12278_v60  ;;  %11279 = vmatpush3.bf16.msra.mxu1 %v11276_v16  ;;  %v5948_v16 = vmul.f32 0.16666667, %v12584_v10 }
 0x419   : > { %11281 = vmatprep.subr.bf16.mxu1 %v12649_v12  ;;  %10703 = vmatprep.mubr.f32.mxu1 %v12272_v57  ;;  %v7191_v21 = vand.u32 4294901760, %v7190_v15 }
 0x41a   : > { %10812 = vmatprep.mubr.f32.mxu0 %v12248_v47 }
 0x41b   : > { %10704 = vmatmul.mubr.f32.gmra.mrb[18].mxu1 %v12278_v60 }
 0x41c   : > { %10813 = vmatmul.mubr.f32.vlgmr.msra.gmra.mrb[16].mxu0 %v12276_v59  ;;  %10710 = vmatprep.mubr.f32.mxu1 %v12248_v47 }
 0x41d   : > { %11331 = vmatpush3.bf16.msra.mxu0 %v12646_v39  ;;  %10815 = vmatprep.mubr.f32.mxu0 %v12281_v61 }
 0x41e   : > { %11333 = vmatprep.subr.bf16.mxu0 %v11332_v20 }
 0x41f   : > { %10711 = vmatmul.mubr.f32.vlgmr.msra.gmra.mrb[16].mxu1 %v12276_v59 }
 0x420   : > { %11283 = vmatpush3.bf16.msra.mxu1 %v12649_v12  ;;  %10816 = vmatmul.mubr.f32.gmra.mrb[18].mxu0 %v12287_v63 }
 0x421   : > { %11285 = vmatprep.subr.bf16.mxu1 %v11284_v34  ;;  %10713 = vmatprep.mubr.f32.mxu1 %v12281_v61 }
 0x422   : > { %10822 = vmatprep.mubr.f32.mxu0 %v12251_v48 }
 0x423   : > { %10714 = vmatmul.mubr.f32.gmra.mrb[18].mxu1 %v12287_v63 }
 0x424   : > { %10823 = vmatmul.mubr.f32.vlgmr.msra.gmra.mrb[16].mxu0 %v12284_v62  ;;  %10720 = vmatprep.mubr.f32.mxu1 %v12251_v48 }
 0x425   : > { %11335 = vmatpush3.bf16.msra.mxu0 %v11332_v20  ;;  %10825 = vmatprep.mubr.f32.mxu0 %v12290_v0 }
 0x426   : > { %11337 = vmatprep.subr.bf16.mxu0 %v12646_v39 }
 0x427   : > { %10721 = vmatmul.mubr.f32.vlgmr.msra.gmra.mrb[16].mxu1 %v12284_v62 }
 0x428   : > { %11287 = vmatpush3.bf16.msra.mxu1 %v11284_v34  ;;  %10826 = vmatmul.mubr.f32.gmra.mrb[18].mxu0 %v12295_v6 }
 0x429   : > { %11289 = vmatprep.subr.bf16.mxu1 %v12649_v12  ;;  %10723 = vmatprep.mubr.f32.mxu1 %v12290_v0 }
 0x42a   : > { %10832 = vmatprep.mubr.f32.mxu0 %v12245_v46 }
 0x42b   : > { %10724 = vmatmul.mubr.f32.gmra.mrb[18].mxu1 %v12295_v6 }
 0x42c   : > { %10833 = vmatmul.mubr.f32.vlgmr.msra.gmra.mrb[16].mxu0 %v12270_v56  ;;  %10730 = vmatprep.mubr.f32.mxu1 %v12245_v46 }
 0x42d   : > { %11339 = vmatpush3.bf16.msra.mxu0 %v12646_v39  ;;  %10835 = vmatprep.mubr.f32.mxu0 %v12272_v57  ;;  %v8329_v39 = vsub.f32 %v8327_v49, %v8328_v58 }
 0x42e   : > { %11389 = vmatprep.subr.bf16.mxu0 %v12205_v9 }
 0x42f   : > { %10731 = vmatmul.mubr.f32.vlgmr.msra.gmra.mrb[16].mxu1 %v12270_v56  ;;  %v8330_v13 = vand.u32 4294901760, %v8329_v39 }
 0x430   : > { %11291 = vmatpush3.bf16.msra.mxu1 %v12649_v12  ;;  %10836 = vmatmul.mubr.f32.gmra.mrb[18].mxu0 %v12278_v60  ;;  %v7180_v12 = vsub.f32 %v7178_v55, %v7179_v3 }
 0x431   : > { %10733 = vmatprep.mubr.f32.mxu1 %v12272_v57  ;;  %10842 = vmatprep.mubr.f32.mxu0 %v12245_v46 }
 0x432   : > { %11341 = vmatprep.subr.bf16.mxu1 %v12205_v9  ;;  %v7181_v20 = vand.u32 4294901760, %v7180_v12 }
 0x433   : > { %10734 = vmatmul.mubr.f32.gmra.mrb[18].mxu1 %v12278_v60 }
 0x434   : > { %10843 = vmatmul.mubr.f32.vlgmr.msra.gmra.mrb[16].mxu0 %v12270_v56  ;;  %10740 = vmatprep.mubr.f32.mxu1 %v12245_v46 }
 0x435   : > { %10845 = vmatprep.mubr.f32.mxu0 %v12272_v57  ;;  %11391 = vmatpush3.bf16.msra.mxu0 %v12205_v9 }
 0x436   : > { %11393 = vmatprep.subr.bf16.mxu0 %v12209_v27 }
 0x437   : > { %10741 = vmatmul.mubr.f32.vlgmr.msra.gmra.mrb[16].mxu1 %v12270_v56 }
 0x438   : > { %10846 = vmatmul.mubr.f32.gmra.mrb[18].mxu0 %v12278_v60  ;;  %10743 = vmatprep.mubr.f32.mxu1 %v12272_v57 }
 0x439   : > { %10954 = vmatprep.mubr.f32.mxu0 %v8330_v13  ;;  %11343 = vmatpush3.bf16.msra.mxu1 %v12205_v9 }
 0x43a   : > { %11345 = vmatprep.subr.bf16.mxu1 %v12209_v27 }
 0x43b   : > { %10744 = vmatmul.mubr.f32.gmra.mrb[18].mxu1 %v12278_v60 }
 0x43c   : > { %10955 = vmatmul.mubr.f32.vlgmr.msra.gmra.mrb[20].mxu0 %v8340_v19  ;;  %10852 = vmatprep.mubr.f32.mxu1 %v7181_v20 }
 0x43d   : > { %11395 = vmatpush3.bf16.msra.mxu0 %v12209_v27  ;;  %10961 = vmatprep.mubr.f32.mxu0 %v12688_v40 }
 0x43e   : > { %11397 = vmatprep.subr.bf16.mxu0 %v12211_v28 }
 0x43f   : > { %10853 = vmatmul.mubr.f32.vlgmr.msra.gmra.mrb[20].mxu1 %v7191_v21 }
 0x440   : > { %11347 = vmatpush3.bf16.msra.mxu1 %v12209_v27  ;;  %10859 = vmatprep.mubr.f32.mxu1 %v12698_v44 }
 0x441   : > { %11349 = vmatprep.subr.bf16.mxu1 %v12211_v28 }
 0x444   : > { %10962 = vmatmul.mubr.f32.vlgmr.msra.gmra.mrb[20].mxu0 %v12696_v11 }
 0x445   : > { %11399 = vmatpush3.bf16.msra.mxu0 %v12211_v28  ;;  %10968 = vmatprep.mubr.f32.mxu0 %v8327_v49 }
 0x446   : > { %11401 = vmatprep.subr.bf16.mxu0 %v12205_v9 }
 0x447   : > { %10860 = vmatmul.mubr.f32.vlgmr.msra.gmra.mrb[20].mxu1 %v12706_v52 }
 0x448   : > { %11351 = vmatpush3.bf16.msra.mxu1 %v12211_v28  ;;  %10866 = vmatprep.mubr.f32.mxu1 %v7178_v55  ;;  %v4825_v28 = vmul.f32 0.8333333, %v12581_v5  ;;  %v5950_v5 = vmul.f32 0.16666667, %v12596_v36 }
 0x449   : > { %11353 = vmatprep.subr.bf16.mxu1 %v12205_v9 }
 0x44c   : > { %10969 = vmatmul.mubr.f32.vlgmr.msra.gmra.mrb[20].mxu0 %v8337_v53 }
 0x44d   : > { %11403 = vmatpush3.bf16.msra.mxu0 %v12205_v9  ;;  %10975 = vmatprep.mubr.f32.mxu0 %v8328_v58 }
 0x44e   : > { %11405 = vmatprep.subr.bf16.mxu0 %v12218_v29 }
 0x44f   : > { %10867 = vmatmul.mubr.f32.vlgmr.msra.gmra.mrb[20].mxu1 %v7188_v1 }
 0x450   : > { %11355 = vmatpush3.bf16.msra.mxu1 %v12205_v9  ;;  %10873 = vmatprep.mubr.f32.mxu1 %v7179_v3 }
 0x451   : > { %11357 = vmatprep.subr.bf16.mxu1 %v12218_v29 }
 0x454   : > { %10976 = vmatmul.mubr.f32.vlgmr.msra.gmra.mrb[20].mxu0 %v8338_v2 }
 0x455   : > { %11407 = vmatpush3.bf16.msra.mxu0 %v12218_v29  ;;  %10982 = vmatprep.mubr.f32.mxu0 %v12688_v40 }
 0x456   : > { %11409 = vmatprep.subr.bf16.mxu0 %v12205_v9 }
 0x457   : > { %10874 = vmatmul.mubr.f32.vlgmr.msra.gmra.mrb[20].mxu1 %v7189_v4 }
 0x458   : > { %11359 = vmatpush3.bf16.msra.mxu1 %v12218_v29  ;;  %10880 = vmatprep.mubr.f32.mxu1 %v12698_v44 }
 0x459   : > { %11361 = vmatprep.subr.bf16.mxu1 %v12205_v9 }
 0x45c   : > { %10983 = vmatmul.mubr.f32.vlgmr.msra.gmra.mrb[20].mxu0 %v12696_v11 }
 0x45d   : > { %11411 = vmatpush3.bf16.msra.mxu0 %v12205_v9  ;;  %10989 = vmatprep.mubr.f32.mxu0 %v12688_v40 }
 0x45f   : > { %10881 = vmatmul.mubr.f32.vlgmr.msra.gmra.mrb[20].mxu1 %v12706_v52 }
 0x460   : > { %11363 = vmatpush3.bf16.msra.mxu1 %v12205_v9  ;;  %10887 = vmatprep.mubr.f32.mxu1 %v12698_v44  ;;  %v4824_v9 = vmul.f32 0.8333333, %v12584_v10 }
 0x464   : > { %10990 = vmatmul.mubr.f32.vlgmr.msra.gmra.mrb[20].mxu0 %v12696_v11 }
 0x465   : > { %10996 = vmatprep.mubr.f32.mxu0 %v12256_v50 }
 0x467   : > { %10888 = vmatmul.mubr.f32.vlgmr.msra.gmra.mrb[20].mxu1 %v12706_v52 }
 0x468   : > { %10894 = vmatprep.mubr.f32.mxu1 %v12256_v50 }
 0x507   : > { %v12766_v27 = vpop.f32.mrb[16].mxu0 }
 0x508   : > { %v12769_v29 = vpop.f32.mrb[17].mxu0  ;;  %v7077_v33 = vmul.f32 0.5, %v12766_v27 }
 0x509   : > { %v7076_v25 = vmul.f32 0.5, %v12769_v29 }
 0x50a   : > { %v10742_v34 = vpop.f32.mrb[16].mxu1 }
 0x50b   : > { %v5928_v50 = vmul.f32 0.16666667, %v10742_v34  ;;  %v5953_v54 = vmul.f32 0.8333333, %v10742_v34  ;;  %v5974_v35 = vmul.f32 0.5, %v10742_v34  ;;  %v12777_v7 = vpop.f32.mrb[18].mxu0 }
 0x50c   : > { %v5905_v37 = vpop.f32.mrb[17].mxu1  ;;  %v12781_v40 = vpop.f32.mrb[19].mxu0  ;;  %v7079_v41 = vmul.f32 0.5, %v12777_v7 }
 0x50d   : > { %v5932_v26 = vadd.f32 %v5928_v50, %v4825_v28  ;;  %v5957_v51 = vadd.f32 %v5953_v54, %v5949_v23  ;;  %v7081_v10 = vadd.f32 %v7077_v33, %v5974_v35  ;;  %v5927_v38 = vmul.f32 0.16666667, %v5905_v37 }
 0x50e   : > { %v5952_v42 = vmul.f32 0.8333333, %v5905_v37  ;;  %v5973_v43 = vmul.f32 0.5, %v5905_v37  ;;  %v10745_v49 = vpop.f32.mrb[18].mxu1  ;;  %v7078_v55 = vmul.f32 0.5, %v12781_v40 }
 0x50f   : > { %v5936_v11 = vmul.f32 %v5932_v26, %v12412_v31  ;;  %v5961_v44 = vmul.f32 %v5957_v51, %v12412_v31  ;;  %v7085_v45 = vmul.f32 %v7081_v10, %v12412_v31  ;;  %v5931_v36 = vadd.f32 %v5927_v38, %v4824_v9  ;;  %v5917_v1 = vpop.f32.mrb[19].mxu1 }
 0x510   : > { %v5956_v52 = vadd.f32 %v5952_v42, %v5948_v16  ;;  %v7080_v53 = vadd.f32 %v7076_v25, %v5973_v43  ;;  %v5930_v58 = vmul.f32 0.16666667, %v10745_v49  ;;  %v5955_v15 = vmul.f32 0.8333333, %v10745_v49 }
 0x511   : > { %v5940_v2 = vadd.f32 %v5936_v11, %v12415_v32  ;;  %v5965_v3 = vadd.f32 %v5961_v44, %v12415_v32  ;;  %v7089_v39 = vadd.f32 %v7085_v45, %v12415_v32  ;;  %v5935_v4 = vmul.f32 %v5931_v36, %v12412_v31 }
 0x512   : > { %v5960_v8 = vmul.f32 %v5956_v52, %v12412_v31  ;;  %v7084_v12 = vmul.f32 %v7080_v53, %v12412_v31  ;;  %v5934_v13 = vadd.f32 %v5930_v58, %v4827_v24  ;;  %v5976_v20 = vmul.f32 0.5, %v10745_v49 }
 0x513   : > { %9635 = vst.msk [vmem:[%s12421_s23 + $0xa8] sm:$0xff] %vm1422_vm2, %v5940_v2  ;;  %9639 = vst.msk [vmem:[%s12421_s23 + $0xc8] sm:$0xff] %vm1422_vm2, %v5965_v3  ;;  %v5939_v19 = vadd.f32 %v5935_v4, %v12415_v32  ;;  %v5929_v21 = vmul.f32 0.16666667, %v5917_v1  ;;  %v5954_v28 = vmul.f32 0.8333333, %v5917_v1  ;;  %v5959_v24 = vadd.f32 %v5955_v15, %v5951_v30 }
 0x514   : > { %9645 = vst.msk [vmem:[%s12421_s23 + $0xe8] sm:$0xff] %vm1422_vm2, %v7089_v39  ;;  %v5964_v23 = vadd.f32 %v5960_v8, %v12415_v32  ;;  %v7088_v9 = vadd.f32 %v7084_v12, %v12415_v32  ;;  %v5938_v16 = vmul.f32 %v5934_v13, %v12412_v31  ;;  %v7083_v33 = vadd.f32 %v7079_v41, %v5976_v20 }
 0x515   : > { %9634 = vst.msk [vmem:[%s12421_s23 + $0xa0] sm:$0xff] %vm1422_vm2, %v5939_v19  ;;  %v5933_v34 = vadd.f32 %v5929_v21, %v4826_v17  ;;  %v5958_v50 = vadd.f32 %v5954_v28, %v5950_v5  ;;  %v5975_v54 = vmul.f32 0.5, %v5917_v1  ;;  %v5963_v35 = vmul.f32 %v5959_v24, %v12412_v31 }
 0x516   : > { %9638 = vst.msk [vmem:[%s12421_s23 + $0xc0] sm:$0xff] %vm1422_vm2, %v5964_v23  ;;  %9644 = vst.msk [vmem:[%s12421_s23 + $0xe0] sm:$0xff] %vm1422_vm2, %v7088_v9  ;;  %v7087_v37 = vmul.f32 %v7083_v33, %v12412_v31 }
 0x517   : > { %9637 = vst.msk [vmem:[%s12421_s23 + $0xb8] sm:$0xff] %vm1422_vm2, %v5938_v16  ;;  %v5937_v30 = vmul.f32 %v5933_v34, %v12412_v31  ;;  %v5962_v26 = vmul.f32 %v5958_v50, %v12412_v31  ;;  %v7082_v17 = vadd.f32 %v7078_v55, %v5975_v54  ;;  %9641 = vst.msk [vmem:[%s12421_s23 + $0xd8] sm:$0xff] %vm1422_vm2, %v5963_v35 }
 0x518   : > { %9647 = vst.msk [vmem:[%s12421_s23 + $0xf8] sm:$0xff] %vm1422_vm2, %v7087_v37  ;;  %v8223_v37 = vmul.f32 0.16666667, %v12781_v40 }
 0x519   : > { %v5941_v5 = vadd.f32 %v5937_v30, %v12415_v32  ;;  %v5966_v51 = vadd.f32 %v5962_v26, %v12415_v32  ;;  %v7086_v10 = vmul.f32 %v7082_v17, %v12412_v31 }
 0x51b   : > { %9636 = vst.msk [vmem:[%s12421_s23 + $0xb0] sm:$0xff] %vm1422_vm2, %v5941_v5  ;;  %9640 = vst.msk [vmem:[%s12421_s23 + $0xd0] sm:$0xff] %vm1422_vm2, %v5966_v51  ;;  %v7090_v38 = vadd.f32 %v7086_v10, %v12415_v32 }
 0x51d   : > { %9646 = vst.msk [vmem:[%s12421_s23 + $0xf0] sm:$0xff] %vm1422_vm2, %v7090_v38 }
 0x537   : > { %v10991_v25 = vpop.f32.mrb[20].mxu0 }
 0x538   : > { %v8765_v41 = vand.u32 4294901760, %v10991_v25  ;;  %v8751_v42 = vpop.f32.mrb[21].mxu0 }
 0x539   : > { %v8762_v43 = vand.u32 4294901760, %v8751_v42 }
 0x53a   : > { %v8877_v11 = vsub.f32 %v10991_v25, %v8765_v41  ;;  %v10889_v44 = vpop.f32.mrb[20].mxu1 }
 0x53b   : > { %v12831_v45 = vpack.c.bf16 %v8765_v41, %v8762_v43  ;;  %v8870_v36 = vsub.f32 %v8751_v42, %v8762_v43  ;;  %v7616_v49 = vand.u32 4294901760, %v10889_v44  ;;  %v7602_v52 = vpop.f32.mrb[21].mxu1 }
 0x53c   : > { %v8878_v53 = vand.u32 4294901760, %v8877_v11  ;;  %v7613_v55 = vand.u32 4294901760, %v7602_v52 }
 0x53d   : > { %v8871_v58 = vand.u32 4294901760, %v8870_v36  ;;  %v7728_v1 = vsub.f32 %v10889_v44, %v7616_v49  ;;  %11413 = vmatprep.subr.bf16.mxu0 %v12831_v45  ;;  %v11420_v2 = vpack.c.bf16 %v8877_v11, %v8870_v36 }
 0x53e   : > { %v8879_v3 = vsub.f32 %v8877_v11, %v8878_v53  ;;  %v12834_v39 = vpack.c.bf16 %v7616_v49, %v7613_v55  ;;  %v7721_v4 = vsub.f32 %v7602_v52, %v7613_v55  ;;  %11415 = vmatpush3.bf16.msra.mxu0 %v12831_v45 }
 0x53f   : > { %v8872_v8 = vsub.f32 %v8870_v36, %v8871_v58  ;;  %v7729_v12 = vand.u32 4294901760, %v7728_v1  ;;  %v11428_v13 = vpack.c.bf16 %v8878_v53, %v8871_v58 }
 0x540   : > { %v7722_v15 = vand.u32 4294901760, %v7721_v4  ;;  %11365 = vmatprep.subr.bf16.mxu1 %v12834_v39  ;;  %v8880_v19 = vand.u32 4294901760, %v8879_v3  ;;  %v11372_v20 = vpack.c.bf16 %v7728_v1, %v7721_v4 }
 0x541   : > { %v7730_v21 = vsub.f32 %v7728_v1, %v7729_v12  ;;  %10997 = vmatmul.mubr.f32.vlgmr.msra.gmra.mrb[22].mxu0 %v12299_v14  ;;  %11367 = vmatpush3.bf16.msra.mxu1 %v12834_v39  ;;  %v8873_v28 = vand.u32 4294901760, %v8872_v8 }
 0x542   : > { %v7723_v23 = vsub.f32 %v7721_v4, %v7722_v15  ;;  %10999 = vmatprep.mubr.f32.mxu0 %v12303_v18  ;;  %v11380_v9 = vpack.c.bf16 %v7729_v12, %v7722_v15 }
 0x543   : > { %v11416_v16 = vpack.c.bf16 %v8880_v19, %v8873_v28  ;;  %v7731_v24 = vand.u32 4294901760, %v7730_v21 }
 0x544   : > { %10895 = vmatmul.mubr.f32.vlgmr.msra.gmra.mrb[22].mxu1 %v12299_v14  ;;  %v7724_v33 = vand.u32 4294901760, %v7723_v23 }
 0x545   : > { %11000 = vmatmul.mubr.f32.gmra.mrb[24].mxu0 %v12306_v22  ;;  %11417 = vmatprep.subr.bf16.mxu0 %v11416_v16 }
 0x546   : > { %11419 = vmatpush3.bf16.msra.mxu0 %v11416_v16  ;;  %10897 = vmatprep.mubr.f32.mxu1 %v12303_v18  ;;  %v11368_v34 = vpack.c.bf16 %v7731_v24, %v7724_v33 }
 0x547   : > { %11421 = vmatprep.subr.bf16.mxu0 %v11420_v2  ;;  %11006 = vmatprep.mubr.f32.mxu0 %v12245_v46 }
 0x548   : > { %10898 = vmatmul.mubr.f32.gmra.mrb[24].mxu1 %v12306_v22  ;;  %11369 = vmatprep.subr.bf16.mxu1 %v11368_v34 }
 0x549   : > { %11007 = vmatmul.mubr.f32.vlgmr.msra.gmra.mrb[22].mxu0 %v12270_v56  ;;  %11371 = vmatpush3.bf16.msra.mxu1 %v11368_v34 }
 0x54a   : > { %11423 = vmatpush3.bf16.msra.mxu0 %v11420_v2  ;;  %11373 = vmatprep.subr.bf16.mxu1 %v11372_v20 }
 0x54b   : > { %11425 = vmatprep.subr.bf16.mxu0 %v12831_v45  ;;  %10904 = vmatprep.mubr.f32.mxu1 %v12245_v46 }
 0x54c   : > { %11009 = vmatprep.mubr.f32.mxu0 %v12272_v57  ;;  %10905 = vmatmul.mubr.f32.vlgmr.msra.gmra.mrb[22].mxu1 %v12270_v56 }
 0x54d   : > { %11010 = vmatmul.mubr.f32.gmra.mrb[24].mxu0 %v12278_v60  ;;  %11375 = vmatpush3.bf16.msra.mxu1 %v11372_v20 }
 0x54e   : > { %11377 = vmatprep.subr.bf16.mxu1 %v12834_v39  ;;  %10907 = vmatprep.mubr.f32.mxu1 %v12272_v57 }
 0x54f   : > { %11016 = vmatprep.mubr.f32.mxu0 %v12248_v47 }
 0x550   : > { %10908 = vmatmul.mubr.f32.gmra.mrb[24].mxu1 %v12278_v60 }
 0x551   : > { %11017 = vmatmul.mubr.f32.vlgmr.msra.gmra.mrb[22].mxu0 %v12276_v59  ;;  %10914 = vmatprep.mubr.f32.mxu1 %v12248_v47  ;;  %v11966_v47 = vmov 0.0  }
 0x552   : > { %11427 = vmatpush3.bf16.msra.mxu0 %v12831_v45  ;;  %11019 = vmatprep.mubr.f32.mxu0 %v12281_v61  ;;  %9668 = vst.msk [vmem:[%s12421_s23 + $0x180] sm:$0xff] %vm1422_vm2, %v11966_v47  ;;  %9669 = vst.msk [vmem:[%s12421_s23 + $0x188] sm:$0xff] %vm1422_vm2, %v11966_v47 }
 0x553   : > { %11429 = vmatprep.subr.bf16.mxu0 %v11428_v13  ;;  %9670 = vst.msk [vmem:[%s12421_s23 + $0x190] sm:$0xff] %vm1422_vm2, %v11966_v47  ;;  %9671 = vst.msk [vmem:[%s12421_s23 + $0x198] sm:$0xff] %vm1422_vm2, %v11966_v47 }
 0x554   : > { %10915 = vmatmul.mubr.f32.vlgmr.msra.gmra.mrb[22].mxu1 %v12276_v59  ;;  %9672 = vst.msk [vmem:[%s12421_s23 + $0x1a0] sm:$0xff] %vm1422_vm2, %v11966_v47  ;;  %9673 = vst.msk [vmem:[%s12421_s23 + $0x1a8] sm:$0xff] %vm1422_vm2, %v11966_v47 }
 0x555   : > { %11379 = vmatpush3.bf16.msra.mxu1 %v12834_v39  ;;  %11020 = vmatmul.mubr.f32.gmra.mrb[24].mxu0 %v12287_v63  ;;  %9674 = vst.msk [vmem:[%s12421_s23 + $0x1b0] sm:$0xff] %vm1422_vm2, %v11966_v47  ;;  %9675 = vst.msk [vmem:[%s12421_s23 + $0x1b8] sm:$0xff] %vm1422_vm2, %v11966_v47 }
 0x556   : > { %11381 = vmatprep.subr.bf16.mxu1 %v11380_v9  ;;  %10917 = vmatprep.mubr.f32.mxu1 %v12281_v61  ;;  %9676 = vst.msk [vmem:[%s12421_s23 + $0x1c0] sm:$0xff] %vm1422_vm2, %v11966_v47  ;;  %9677 = vst.msk [vmem:[%s12421_s23 + $0x1c8] sm:$0xff] %vm1422_vm2, %v11966_v47  ;;  %v8221_v61 = vmul.f32 0.16666667, %v12769_v29 }
 0x557   : > { %11026 = vmatprep.mubr.f32.mxu0 %v12251_v48  ;;  %9678 = vst.msk [vmem:[%s12421_s23 + $0x1d0] sm:$0xff] %vm1422_vm2, %v11966_v47  ;;  %9679 = vst.msk [vmem:[%s12421_s23 + $0x1d8] sm:$0xff] %vm1422_vm2, %v11966_v47 }
 0x558   : > { %10918 = vmatmul.mubr.f32.gmra.mrb[24].mxu1 %v12287_v63  ;;  %9680 = vst.msk [vmem:[%s12421_s23 + $0x1e0] sm:$0xff] %vm1422_vm2, %v11966_v47  ;;  %9681 = vst.msk [vmem:[%s12421_s23 + $0x1e8] sm:$0xff] %vm1422_vm2, %v11966_v47 }
 0x559   : > { %11027 = vmatmul.mubr.f32.vlgmr.msra.gmra.mrb[22].mxu0 %v12284_v62  ;;  %10924 = vmatprep.mubr.f32.mxu1 %v12251_v48  ;;  %9682 = vst.msk [vmem:[%s12421_s23 + $0x1f0] sm:$0xff] %vm1422_vm2, %v11966_v47  ;;  %9683 = vst.msk [vmem:[%s12421_s23 + $0x1f8] sm:$0xff] %vm1422_vm2, %v11966_v47  ;;  %v7098_v48 = vmul.f32 0.8333333, %v12766_v27 }
 0x55a   : > { %11431 = vmatpush3.bf16.msra.mxu0 %v11428_v13  ;;  %11029 = vmatprep.mubr.f32.mxu0 %v12290_v0  ;;  %9684 = vst.msk [vmem:[%s12421_s23 + $0x200] sm:$0xff] %vm1422_vm2, %v11966_v47  ;;  %9685 = vst.msk [vmem:[%s12421_s23 + $0x208] sm:$0xff] %vm1422_vm2, %v11966_v47 }
 0x55b   : > { %11433 = vmatprep.subr.bf16.mxu0 %v12831_v45  ;;  %9686 = vst.msk [vmem:[%s12421_s23 + $0x210] sm:$0xff] %vm1422_vm2, %v11966_v47  ;;  %9687 = vst.msk [vmem:[%s12421_s23 + $0x218] sm:$0xff] %vm1422_vm2, %v11966_v47 }
 0x55c   : > { %10925 = vmatmul.mubr.f32.vlgmr.msra.gmra.mrb[22].mxu1 %v12284_v62  ;;  %9688 = vst.msk [vmem:[%s12421_s23 + $0x220] sm:$0xff] %vm1422_vm2, %v11966_v47  ;;  %9689 = vst.msk [vmem:[%s12421_s23 + $0x228] sm:$0xff] %vm1422_vm2, %v11966_v47  ;;  %v7100_v62 = vmul.f32 0.8333333, %v12777_v7 }
 0x55d   : > { %11383 = vmatpush3.bf16.msra.mxu1 %v11380_v9  ;;  %11030 = vmatmul.mubr.f32.gmra.mrb[24].mxu0 %v12295_v6  ;;  %9690 = vst.msk [vmem:[%s12421_s23 + $0x230] sm:$0xff] %vm1422_vm2, %v11966_v47  ;;  %9691 = vst.msk [vmem:[%s12421_s23 + $0x238] sm:$0xff] %vm1422_vm2, %v11966_v47 }
 0x55e   : > { %11385 = vmatprep.subr.bf16.mxu1 %v12834_v39  ;;  %10927 = vmatprep.mubr.f32.mxu1 %v12290_v0  ;;  %9692 = vst.msk [vmem:[%s12421_s23 + $0x240] sm:$0xff] %vm1422_vm2, %v11966_v47  ;;  %9693 = vst.msk [vmem:[%s12421_s23 + $0x248] sm:$0xff] %vm1422_vm2, %v11966_v47  ;;  %v8224_v0 = vmul.f32 0.16666667, %v12777_v7 }
 0x55f   : > { %11036 = vmatprep.mubr.f32.mxu0 %v12245_v46  ;;  %9694 = vst.msk [vmem:[%s12421_s23 + $0x250] sm:$0xff] %vm1422_vm2, %v11966_v47  ;;  %9695 = vst.msk [vmem:[%s12421_s23 + $0x258] sm:$0xff] %vm1422_vm2, %v11966_v47 }
 0x560   : > { %10928 = vmatmul.mubr.f32.gmra.mrb[24].mxu1 %v12295_v6  ;;  %9696 = vst.msk [vmem:[%s12421_s23 + $0x260] sm:$0xff] %vm1422_vm2, %v11966_v47  ;;  %9697 = vst.msk [vmem:[%s12421_s23 + $0x268] sm:$0xff] %vm1422_vm2, %v11966_v47  ;;  %v7099_v6 = vmul.f32 0.8333333, %v12781_v40 }
 0x561   : > { %11037 = vmatmul.mubr.f32.vlgmr.msra.gmra.mrb[22].mxu0 %v12270_v56  ;;  %10934 = vmatprep.mubr.f32.mxu1 %v12245_v46  ;;  %9698 = vst.msk [vmem:[%s12421_s23 + $0x270] sm:$0xff] %vm1422_vm2, %v11966_v47  ;;  %9699 = vst.msk [vmem:[%s12421_s23 + $0x278] sm:$0xff] %vm1422_vm2, %v11966_v47 }
 0x562   : > { %11435 = vmatpush3.bf16.msra.mxu0 %v12831_v45  ;;  %11039 = vmatprep.mubr.f32.mxu0 %v12272_v57  ;;  %9700 = vst.msk [vmem:[%s12421_s23 + $0x280] sm:$0xff] %vm1422_vm2, %v11966_v47  ;;  %9701 = vst.msk [vmem:[%s12421_s23 + $0x288] sm:$0xff] %vm1422_vm2, %v11966_v47 }
 0x563   : > { %9702 = vst.msk [vmem:[%s12421_s23 + $0x290] sm:$0xff] %vm1422_vm2, %v11966_v47  ;;  %9703 = vst.msk [vmem:[%s12421_s23 + $0x298] sm:$0xff] %vm1422_vm2, %v11966_v47 }
 0x564   : > { %10935 = vmatmul.mubr.f32.vlgmr.msra.gmra.mrb[22].mxu1 %v12270_v56  ;;  %9704 = vst.msk [vmem:[%s12421_s23 + $0x2a0] sm:$0xff] %vm1422_vm2, %v11966_v47  ;;  %9705 = vst.msk [vmem:[%s12421_s23 + $0x2a8] sm:$0xff] %vm1422_vm2, %v11966_v47 }
 0x565   : > { %11387 = vmatpush3.bf16.msra.mxu1 %v12834_v39  ;;  %11040 = vmatmul.mubr.f32.gmra.mrb[24].mxu0 %v12278_v60  ;;  %9706 = vst.msk [vmem:[%s12421_s23 + $0x2b0] sm:$0xff] %vm1422_vm2, %v11966_v47  ;;  %9707 = vst.msk [vmem:[%s12421_s23 + $0x2b8] sm:$0xff] %vm1422_vm2, %v11966_v47 }
 0x566   : > { %10937 = vmatprep.mubr.f32.mxu1 %v12272_v57  ;;  %11046 = vmatprep.mubr.f32.mxu0 %v12245_v46  ;;  %9708 = vst.msk [vmem:[%s12421_s23 + $0x2c0] sm:$0xff] %vm1422_vm2, %v11966_v47  ;;  %9709 = vst.msk [vmem:[%s12421_s23 + $0x2c8] sm:$0xff] %vm1422_vm2, %v11966_v47 }
 0x567   : > { %9710 = vst.msk [vmem:[%s12421_s23 + $0x2d0] sm:$0xff] %vm1422_vm2, %v11966_v47  ;;  %9711 = vst.msk [vmem:[%s12421_s23 + $0x2d8] sm:$0xff] %vm1422_vm2, %v11966_v47 }
 0x568   : > { %10938 = vmatmul.mubr.f32.gmra.mrb[24].mxu1 %v12278_v60  ;;  %9712 = vst.msk [vmem:[%s12421_s23 + $0x2e0] sm:$0xff] %vm1422_vm2, %v11966_v47  ;;  %9713 = vst.msk [vmem:[%s12421_s23 + $0x2e8] sm:$0xff] %vm1422_vm2, %v11966_v47 }
 0x569   : > { %11047 = vmatmul.mubr.f32.vlgmr.msra.gmra.mrb[22].mxu0 %v12270_v56  ;;  %10944 = vmatprep.mubr.f32.mxu1 %v12245_v46  ;;  %9714 = vst.msk [vmem:[%s12421_s23 + $0x2f0] sm:$0xff] %vm1422_vm2, %v11966_v47  ;;  %9715 = vst.msk [vmem:[%s12421_s23 + $0x2f8] sm:$0xff] %vm1422_vm2, %v11966_v47 }
 0x56a   : > { %11049 = vmatprep.mubr.f32.mxu0 %v12272_v57  ;;  %9716 = vst.msk [vmem:[%s12421_s23 + $0x300] sm:$0xff] %vm1422_vm2, %v11966_v47  ;;  %9717 = vst.msk [vmem:[%s12421_s23 + $0x308] sm:$0xff] %vm1422_vm2, %v11966_v47 }
 0x56b   : > { %9718 = vst.msk [vmem:[%s12421_s23 + $0x310] sm:$0xff] %vm1422_vm2, %v11966_v47  ;;  %9719 = vst.msk [vmem:[%s12421_s23 + $0x318] sm:$0xff] %vm1422_vm2, %v11966_v47 }
 0x56c   : > { %10945 = vmatmul.mubr.f32.vlgmr.msra.gmra.mrb[22].mxu1 %v12270_v56  ;;  %9720 = vst.msk [vmem:[%s12421_s23 + $0x320] sm:$0xff] %vm1422_vm2, %v11966_v47  ;;  %9721 = vst.msk [vmem:[%s12421_s23 + $0x328] sm:$0xff] %vm1422_vm2, %v11966_v47  ;;  %v8222_v56 = vmul.f32 0.16666667, %v12766_v27 }
 0x56d   : > { %11050 = vmatmul.mubr.f32.gmra.mrb[24].mxu0 %v12278_v60  ;;  %10947 = vmatprep.mubr.f32.mxu1 %v12272_v57  ;;  %9722 = vst.msk [vmem:[%s12421_s23 + $0x330] sm:$0xff] %vm1422_vm2, %v11966_v47  ;;  %9723 = vst.msk [vmem:[%s12421_s23 + $0x338] sm:$0xff] %vm1422_vm2, %v11966_v47 }
 0x56e   : > { %9724 = vst.msk [vmem:[%s12421_s23 + $0x340] sm:$0xff] %vm1422_vm2, %v11966_v47  ;;  %9725 = vst.msk [vmem:[%s12421_s23 + $0x348] sm:$0xff] %vm1422_vm2, %v11966_v47 }
 0x56f   : > { %9726 = vst.msk [vmem:[%s12421_s23 + $0x350] sm:$0xff] %vm1422_vm2, %v11966_v47  ;;  %9727 = vst.msk [vmem:[%s12421_s23 + $0x358] sm:$0xff] %vm1422_vm2, %v11966_v47 }
 0x570   : > { %10948 = vmatmul.mubr.f32.gmra.mrb[24].mxu1 %v12278_v60  ;;  %9728 = vst.msk [vmem:[%s12421_s23 + $0x360] sm:$0xff] %vm1422_vm2, %v11966_v47  ;;  %9729 = vst.msk [vmem:[%s12421_s23 + $0x368] sm:$0xff] %vm1422_vm2, %v11966_v47  ;;  %v7097_v60 = vmul.f32 0.8333333, %v12769_v29 }
 0x571   : > { %9730 = vst.msk [vmem:[%s12421_s23 + $0x370] sm:$0xff] %vm1422_vm2, %v11966_v47  ;;  %9731 = vst.msk [vmem:[%s12421_s23 + $0x378] sm:$0xff] %vm1422_vm2, %v11966_v47 }
 0x572   : > { %9732 = vst.msk [vmem:[%s12421_s23 + $0x380] sm:$0xff] %vm1422_vm2, %v11966_v47  ;;  %9733 = vst.msk [vmem:[%s12421_s23 + $0x388] sm:$0xff] %vm1422_vm2, %v11966_v47 }
 0x573   : > { %9734 = vst.msk [vmem:[%s12421_s23 + $0x390] sm:$0xff] %vm1422_vm2, %v11966_v47  ;;  %9735 = vst.msk [vmem:[%s12421_s23 + $0x398] sm:$0xff] %vm1422_vm2, %v11966_v47 }
 0x574   : > { %9736 = vst.msk [vmem:[%s12421_s23 + $0x3a0] sm:$0xff] %vm1422_vm2, %v11966_v47  ;;  %9737 = vst.msk [vmem:[%s12421_s23 + $0x3a8] sm:$0xff] %vm1422_vm2, %v11966_v47 }
 0x575   : > { %9738 = vst.msk [vmem:[%s12421_s23 + $0x3b0] sm:$0xff] %vm1422_vm2, %v11966_v47  ;;  %9739 = vst.msk [vmem:[%s12421_s23 + $0x3b8] sm:$0xff] %vm1422_vm2, %v11966_v47 }
 0x576   : > { %9740 = vst.msk [vmem:[%s12421_s23 + $0x3c0] sm:$0xff] %vm1422_vm2, %v11966_v47  ;;  %9741 = vst.msk [vmem:[%s12421_s23 + $0x3c8] sm:$0xff] %vm1422_vm2, %v11966_v47 }
 0x577   : > { %9742 = vst.msk [vmem:[%s12421_s23 + $0x3d0] sm:$0xff] %vm1422_vm2, %v11966_v47  ;;  %9743 = vst.msk [vmem:[%s12421_s23 + $0x3d8] sm:$0xff] %vm1422_vm2, %v11966_v47 }
 0x578   : > { %9744 = vst.msk [vmem:[%s12421_s23 + $0x3e0] sm:$0xff] %vm1422_vm2, %v11966_v47  ;;  %9745 = vst.msk [vmem:[%s12421_s23 + $0x3e8] sm:$0xff] %vm1422_vm2, %v11966_v47 }
 0x579   : > { %9746 = vst.msk [vmem:[%s12421_s23 + $0x3f0] sm:$0xff] %vm1422_vm2, %v11966_v47  ;;  %9747 = vst.msk [vmem:[%s12421_s23 + $0x3f8] sm:$0xff] %vm1422_vm2, %v11966_v47 }
 0x63c   : > { %v11048_v46 = vpop.f32.mrb[22].mxu0 }
 0x63d   : > { %v9371_v57 = vmul.f32 %v11048_v46, %v12412_v31  ;;  %v9327_v59 = vpop.f32.mrb[23].mxu0  ;;  %v9350_v14 = vmul.f32 0.5, %v11048_v46 }
 0x63e   : > { %v9370_v63 = vmul.f32 %v9327_v59, %v12412_v31  ;;  %v9349_v30 = vmul.f32 0.5, %v9327_v59 }
 0x63f   : > { %v9375_v18 = vadd.f32 %v9371_v57, %v12415_v32  ;;  %v10946_v22 = vpop.f32.mrb[22].mxu1 }
 0x640   : > { %v9374_v27 = vadd.f32 %v9370_v63, %v12415_v32  ;;  %v8201_v50 = vmul.f32 0.16666667, %v10946_v22  ;;  %v8226_v54 = vmul.f32 0.8333333, %v10946_v22  ;;  %v8247_v35 = vmul.f32 0.5, %v10946_v22  ;;  %v11051_v29 = vpop.f32.mrb[24].mxu0 }
 0x641   : > { %9665 = vst.msk [vmem:[%s12421_s23 + $0x168] sm:$0xff] %vm1422_vm2, %v9375_v18  ;;  %v9352_v7 = vmul.f32 0.5, %v11051_v29  ;;  %v9373_v26 = vmul.f32 %v11051_v29, %v12412_v31  ;;  %v8178_v17 = vpop.f32.mrb[23].mxu1  ;;  %v9339_v5 = vpop.f32.mrb[25].mxu0 }
 0x642   : > { %9664 = vst.msk [vmem:[%s12421_s23 + $0x160] sm:$0xff] %vm1422_vm2, %v9374_v27  ;;  %v8205_v51 = vadd.f32 %v8201_v50, %v7098_v48  ;;  %v8230_v10 = vadd.f32 %v8226_v54, %v8222_v56  ;;  %v9354_v38 = vadd.f32 %v9350_v14, %v8247_v35  ;;  %v8200_v25 = vmul.f32 0.16666667, %v8178_v17 }
 0x643   : > { %9667 = vst.msk [vmem:[%s12421_s23 + $0x178] sm:$0xff] %vm1422_vm2, %v9373_v26  ;;  %v8225_v41 = vmul.f32 0.8333333, %v8178_v17  ;;  %v8246_v42 = vmul.f32 0.5, %v8178_v17  ;;  %v9351_v43 = vmul.f32 0.5, %v9339_v5  ;;  %v9372_v40 = vmul.f32 %v9339_v5, %v12412_v31  ;;  %v10949_v11 = vpop.f32.mrb[24].mxu1 }
 0x644   : > { %v8209_v44 = vmul.f32 %v8205_v51, %v12412_v31  ;;  %v8234_v45 = vmul.f32 %v8230_v10, %v12412_v31  ;;  %v9358_v36 = vmul.f32 %v9354_v38, %v12412_v31  ;;  %v8204_v49 = vadd.f32 %v8200_v25, %v7097_v60  ;;  %v8190_v52 = vpop.f32.mrb[25].mxu1 }
 0x645   : > { %v8229_v53 = vadd.f32 %v8225_v41, %v8221_v61  ;;  %v9353_v55 = vadd.f32 %v9349_v30, %v8246_v42  ;;  %v9376_v58 = vadd.f32 %v9372_v40, %v12415_v32  ;;  %v8203_v1 = vmul.f32 0.16666667, %v10949_v11 }
 0x646   : > { %v8213_v2 = vadd.f32 %v8209_v44, %v12415_v32  ;;  %v8238_v3 = vadd.f32 %v8234_v45, %v12415_v32  ;;  %v9362_v39 = vadd.f32 %v9358_v36, %v12415_v32  ;;  %v8208_v4 = vmul.f32 %v8204_v49, %v12412_v31 }
 0x647   : > { %v8233_v8 = vmul.f32 %v8229_v53, %v12412_v31  ;;  %v9357_v12 = vmul.f32 %v9353_v55, %v12412_v31  ;;  %9666 = vst.msk [vmem:[%s12421_s23 + $0x170] sm:$0xff] %vm1422_vm2, %v9376_v58  ;;  %v8207_v13 = vadd.f32 %v8203_v1, %v7100_v62  ;;  %v8228_v15 = vmul.f32 0.8333333, %v10949_v11 }
 0x648   : > { %9651 = vst.msk [vmem:[%s12421_s23 + $0x108] sm:$0xff] %vm1422_vm2, %v8213_v2  ;;  %9655 = vst.msk [vmem:[%s12421_s23 + $0x128] sm:$0xff] %vm1422_vm2, %v8238_v3  ;;  %v8212_v19 = vadd.f32 %v8208_v4, %v12415_v32  ;;  %v8249_v20 = vmul.f32 0.5, %v10949_v11  ;;  %v8202_v21 = vmul.f32 0.16666667, %v8190_v52  ;;  %v8248_v46 = vmul.f32 0.5, %v8190_v52 }
 0x649   : > { %9661 = vst.msk [vmem:[%s12421_s23 + $0x148] sm:$0xff] %vm1422_vm2, %v9362_v39  ;;  %v8227_v28 = vmul.f32 0.8333333, %v8190_v52  ;;  %v8237_v23 = vadd.f32 %v8233_v8, %v12415_v32  ;;  %v9361_v9 = vadd.f32 %v9357_v12, %v12415_v32  ;;  %v8211_v16 = vmul.f32 %v8207_v13, %v12412_v31 }
 0x64a   : > { %v8232_v24 = vadd.f32 %v8228_v15, %v8224_v0  ;;  %9650 = vst.msk [vmem:[%s12421_s23 + $0x100] sm:$0xff] %vm1422_vm2, %v8212_v19  ;;  %v9356_v33 = vadd.f32 %v9352_v7, %v8249_v20  ;;  %v8206_v34 = vadd.f32 %v8202_v21, %v7099_v6  ;;  %v9355_v60 = vadd.f32 %v9351_v43, %v8248_v46 }
 0x64b   : > { %v8231_v47 = vadd.f32 %v8227_v28, %v8223_v37  ;;  %9654 = vst.msk [vmem:[%s12421_s23 + $0x120] sm:$0xff] %vm1422_vm2, %v8237_v23  ;;  %9660 = vst.msk [vmem:[%s12421_s23 + $0x140] sm:$0xff] %vm1422_vm2, %v9361_v9 }
 0x64c   : > { %9653 = vst.msk [vmem:[%s12421_s23 + $0x118] sm:$0xff] %vm1422_vm2, %v8211_v16  ;;  %v8236_v48 = vmul.f32 %v8232_v24, %v12412_v31  ;;  %v9360_v56 = vmul.f32 %v9356_v33, %v12412_v31  ;;  %v8210_v57 = vmul.f32 %v8206_v34, %v12412_v31  ;;  %v9359_v63 = vmul.f32 %v9355_v60, %v12412_v31 }
 0x64d   : > { %v8235_v59 = vmul.f32 %v8231_v47, %v12412_v31 }
 0x64e   : > { %9657 = vst.msk [vmem:[%s12421_s23 + $0x138] sm:$0xff] %vm1422_vm2, %v8236_v48  ;;  %9663 = vst.msk [vmem:[%s12421_s23 + $0x158] sm:$0xff] %vm1422_vm2, %v9360_v56  ;;  %v8214_v61 = vadd.f32 %v8210_v57, %v12415_v32  ;;  %v9363_v0 = vadd.f32 %v9359_v63, %v12415_v32 }
 0x64f   : > { %v8239_v62 = vadd.f32 %v8235_v59, %v12415_v32 }
 0x650   : > { %9652 = vst.msk [vmem:[%s12421_s23 + $0x110] sm:$0xff] %vm1422_vm2, %v8214_v61  ;;  %9662 = vst.msk [vmem:[%s12421_s23 + $0x150] sm:$0xff] %vm1422_vm2, %v9363_v0 }
 0x651   : > { %9656 = vst.msk [vmem:[%s12421_s23 + $0x130] sm:$0xff] %vm1422_vm2, %v8239_v62 }
 0x652   : > { %11866 = shalt.err (!%p11863_p0)
}
 0x653   : > { %s11867_s10 = scalar_lea.hbm %s13200_s27, 16384  ;;  %s11871_s6 = scalar_lea.hbm %s13267_s4, 131072 }
 0x654   : > { %p11868_p6 = scmp.ne.s32.totalorder %s13200_s27, %s11867_s10  ;;  %p11872_p4 = scmp.lt.u32.totalorder %s13200_s27, %s13267_s4 }
 0x655   : > { %p11873_p10 = scmp.lt.u32.totalorder %s11871_s6, %s11867_s10  ;;  %p11875_p7 = scmp.lt.u32.totalorder %s11867_s10, %s13200_s27 }
 0x656   : > { %p11869_p8 = pnand %p11868_p6, %p13299_p9 }
 0x657   : > { %p11874_p1 = por %p11873_p10, %p11872_p4 }
 0x658   : > { %p11870_p5 = pneg %p11869_p8 }
 0x659   : > { %p11876_p11 = por %p11875_p7, %p11874_p1 }
 0x65b   : > { %p11877_p13 = pnand %p11876_p11, %p11870_p5 }
 0x65d   : > { %11880 = shalt.err (!%p11877_p13)
}
 0x65e   : > { %s11968_s30 = smov 128   ;;  %s11969_s19 = smov 8  }
 0x65f   : > { %11686 = dma.vmem_to_hbm [thread:$0]  (%p13299_p9), %s13202_s20, 16384, %s13200_s27, %s9465_s7, %s11968_s30, %s11968_s30, %s11969_s19  }
 0x660 PF: > { %p11708_p3 = scmp.ge.s32.totalorder %s11959_s22, 2  ;;  %s9495_s18 = sand.u32 1, %s11931_s15  }
 0x661   : > { %p13300_p12 = scmp.ne.s32.totalorder %s13286_s29, 0  ;;  %s9496_s21 = scalar_lea.sflag [#allocation4], %s9495_s18 }
 0x663   : > { %p11700_p2 = pnand %p11708_p3, %p13300_p12 }
 0x665   : > { %11926 = dma.done.wait (!%p11700_p2), %s9496_s21, 16384  }
 0x666   : > { %11928 = vsyncadd (!%p11700_p2), %s9496_s21, 4294950912  ;;  %s22_s22 = sadd.s32 1, %s11959_s22   ;;  %s13301_s18 = sld [smem:[#allocation14_spill]] }
 0x667   : > { %p19_p0 = scmp.ge.s32.totalorder %s22_s22, 10   ;;  %s13302_s19 = sld [smem:[#allocation15_spill]] }
 0x668   : > { %s13303_s15 = smov %s11935_s16  ;;  %s13304_s16 = smov %s11939_s17 }
 0x669   : > { %s13305_s17 = smov %s12178_s8  ;;  %s13306_s20 = smov %s13309_s24 }
 0x66a   : > { %s13307_s21 = smov %s13313_s26  ;;  %21 = sbr.rel (!%p19_p0) target bundleno = 12 (0xc), region = 109 }
 0x671   :  { %9501 = vsyncpa [#allocation3], 1 }
 0x672   :  { %9503 = vsyncpa [#allocation3 + $0x1], 1 }
 0x673   :  { %9504 = vsyncpa [#allocation8], 1 }
 0x674   :  { %9505 = vsyncpa [#allocation4], 1 }
 0x675   :  { %9507 = vsyncpa [#allocation4 + $0x1], 1 }
 0x676   :  { %9508 = vsyncpa [#allocation5], 1 }
 0x677   :  { %9510 = vsyncpa [#allocation5 + $0x1], 1 }

</bundles_post_ra>
